<compile_context>
chip_gen: v5e
topology: v5e:2x2
jax: 0.10.0
libtpu: 0.0.40
codegen_flags: <defaults>
</compile_context>

<pallas_src>
import jax
import jax.numpy as jnp
from jax.experimental import pallas as pl
from jax.experimental.pallas import tpu as pltpu

LANE = 128
SUBLANE = 8


def _round_up(x, m):
    return ((x + m - 1) // m) * m


def _head_kernel(x_ref, w1_ref, b1_ref, w2_ref, b2_ref, o_ref, acc_ref):
    """One (batch-tile, K-tile) step: partial ReLU(x) @ W1 with f32 accumulation;
    fc1-bias + ReLU + fc2 finalize on the last K tile."""
    k = pl.program_id(1)

    @pl.when(k == 0)
    def _init():
        acc_ref[...] = jnp.zeros_like(acc_ref)

    # pr0: ReLU on this chunk of the flattened backbone features (native
    # dtype), then the partial fc1 matmul on the MXU with f32 accumulation.
    x = jnp.maximum(x_ref[...], 0.0).astype(w1_ref.dtype)
    acc_ref[...] += jnp.dot(x, w1_ref[...], preferred_element_type=jnp.float32)

    @pl.when(k == pl.num_programs(1) - 1)
    def _finalize():
        # fc1 bias + pr1 ReLU (f32).
        h = jnp.maximum(acc_ref[...] + b1_ref[...], 0.0)
        # dp1: nn.Dropout()
        # TODO(synk): dropout implemented as eval-mode identity (train-mode
        # p=0.5 masking + 1/(1-p) scaling omitted).
        # fc2: Linear(1024, num_classes) + bias, lane-padded dense store.
        o_ref[...] = (
            jnp.dot(h.astype(w2_ref.dtype), w2_ref[...],
                    preferred_element_type=jnp.float32) + b2_ref[...]
        ).astype(o_ref.dtype)


def prepare_head_params(w1, b1, w2, b2, *, block_k=2048,
                        compute_dtype=jnp.bfloat16):
    """One-time weight prep: zero-pad + cast to the compute dtype.

    Call this ONCE (e.g. at model load) and reuse the result for every forward
    call; keeping it out of the per-call path avoids re-reading/re-writing the
    dominant W1 stream on every step.
    """
    # TODO(synk): on v7x, compute_dtype=jnp.float8_e4m3fn would halve the W1
    # HBM stream again (MXU consumes fp8 natively) - needs accuracy sign-off.
    F_in, H = w1.shape
    C_out = w2.shape[1]

    # Lane-pad the tiny class dim so fc2 / the final store are lane-dense.
    C_pad = _round_up(C_out, LANE)

    # K-tile size: multiple of 128, capped by block_k and by the padded F_in.
    TK = _round_up(min(block_k, _round_up(F_in, LANE)), LANE)
    F_pad = _round_up(F_in, TK)

    w1p = jnp.pad(w1, ((0, F_pad - F_in), (0, 0))).astype(compute_dtype)
    w2p = jnp.pad(w2, ((0, 0), (0, C_pad - C_out))).astype(compute_dtype)
    b1p = b1.reshape(1, H).astype(jnp.float32)
    b2p = jnp.pad(b2, (0, C_pad - C_out)).reshape(1, C_pad).astype(jnp.float32)

    meta = dict(F_in=F_in, F_pad=F_pad, TK=TK, H=H, C_out=C_out, C_pad=C_pad,
                compute_dtype=compute_dtype)
    return (w1p, b1p, w2p, b2p), meta


def cnnnet_head(x_feat, params, meta, *, block_b=128):
    """x_feat: (B, C, D, H, W) backbone output -> (B, num_classes) logits."""
    w1p, b1p, w2p, b2p = params
    F_in, F_pad, TK = meta["F_in"], meta["F_pad"], meta["TK"]
    H, C_out, C_pad = meta["H"], meta["C_out"], meta["C_pad"]

    B = x_feat.shape[0]
    # Flatten (glue); keep the backbone's native dtype (no f32 up-cast here:
    # ReLU + cast happen in-kernel).
    x2d = x_feat.reshape(B, -1)
    assert x2d.shape[1] == F_in

    # Pad K (inert through ReLU + matmul against zero-padded W1 rows).
    if F_pad != F_in:
        x2d = jnp.pad(x2d, ((0, 0), (0, F_pad - F_in)))

    # Batch tiling: sublane-aligned tiles on a "parallel" axis so the W1
    # stream is amortized and v7x's second TensorCore gets work.
    TB = _round_up(min(block_b, _round_up(B, SUBLANE)), SUBLANE)
    B_pad = _round_up(B, TB)
    if B_pad != B:
        x2d = jnp.pad(x2d, ((0, B_pad - B), (0, 0)))
    n_b = B_pad // TB
    n_k = F_pad // TK

    w_itemsize = jnp.dtype(meta["compute_dtype"]).itemsize
    x_itemsize = jnp.dtype(x2d.dtype).itemsize
    cost = pl.CostEstimate(
        flops=2 * B * F_in * H + 2 * B * H * C_out,
        transcendentals=0,
        bytes_accessed=(w1p.size * w_itemsize + w2p.size * w_itemsize
                        + x2d.size * x_itemsize + B_pad * C_pad * 4
                        + (H + C_pad) * 4),
    )

    out = pl.pallas_call(
        _head_kernel,
        out_shape=jax.ShapeDtypeStruct((B_pad, C_pad), jnp.float32),
        grid_spec=pltpu.PrefetchScalarGridSpec(
            num_scalar_prefetch=0,
            grid=(n_b, n_k),
            in_specs=[
                # Activation chunk (streamed per (b, k)).
                pl.BlockSpec((TB, TK), lambda b, k: (b, k)),
                # W1 chunk: the dominant HBM stream, double-buffered over k.
                pl.BlockSpec((TK, H), lambda b, k: (k, 0)),
                # Residents: fetched once -> single-buffered.
                pl.BlockSpec((1, H), lambda b, k: (0, 0),
                             pipeline_mode=pl.Buffered(1)),
                pl.BlockSpec((H, C_pad), lambda b, k: (0, 0),
                             pipeline_mode=pl.Buffered(1)),
                pl.BlockSpec((1, C_pad), lambda b, k: (0, 0),
                             pipeline_mode=pl.Buffered(1)),
            ],
            out_specs=pl.BlockSpec((TB, C_pad), lambda b, k: (b, 0)),
            scratch_shapes=[pltpu.VMEM((TB, H), jnp.float32)],  # fc1 accumulator
        ),
        compiler_params=pltpu.CompilerParams(
            # Batch tiles are independent (megacore-shardable); K is a reduction.
            dimension_semantics=("parallel", "arbitrary"),
            # Raise v5e's 16 MiB default so TK=2048 double-buffered W1 fits;
            # 32 MiB is <= every generation's physical VMEM.
            vmem_limit_bytes=32 * 1024 * 1024,
        ),
        cost_estimate=cost,
    )(x2d, w1p, b1p, w2p, b2p)

    return out[:B, :C_out]


def xavier_normal(key, shape, gain):
    # Matches torch.nn.init.xavier_normal_ on an (in, out) matrix.
    fan_in, fan_out = shape[0], shape[1]
    std = gain * (2.0 / (fan_in + fan_out)) ** 0.5
    return std * jax.random.normal(key, shape, dtype=jnp.float32)


def _ref_head(x_feat, w1, b1, w2, b2, dtype):
    # Pure-JAX reference with the same low-precision-rounded operands and
    # f32 accumulation.
    def rt(a):
        return a.astype(dtype).astype(jnp.float32)
    xr = jnp.maximum(x_feat.reshape(x_feat.shape[0], -1).astype(jnp.float32), 0.0)
    h = rt(xr) @ rt(w1) + b1
    h = jnp.maximum(h, 0.0)
    return rt(h) @ rt(w2) + b2


if __name__ == "__main__":
    key = jax.random.PRNGKey(0)
    k_x, k_w1, k_w2 = jax.random.split(key, 3)

    # Shapes consistent with the module: the 3-D ResNet backbone yields a
    # (B, in_features, 1, 3, 3) feature map, so num_ftrs = 9 * in_features
    # (resnet18 -> in_features = 512; scaled down to 64 here).  Batch is a
    # multiple of 8 so sublanes / MXU rows are filled (per perf review).
    B, C, D, Hs, Ws = 16, 64, 1, 3, 3
    num_ftrs = C * D * Hs * Ws            # 9 * 64 = 576
    hidden = 1024                         # fixed by the module
    num_classes = 7

    # TODO(synk): the external 3-D ResNet backbone (`resnet.resnet18/34/50/101`)
    # is not part of this module's source; its output features are synthesized
    # (in bf16, the backbone's typical native dtype).
    x = jax.random.normal(k_x, (B, C, D, Hs, Ws), dtype=jnp.float32).astype(
        jnp.bfloat16)

    gain = 2.0 ** 0.5                     # np.sqrt(2) as in weights_init
    w1 = xavier_normal(k_w1, (num_ftrs, hidden), gain)
    b1 = jnp.zeros((hidden,), jnp.float32)        # constant_(bias, 0)
    w2 = xavier_normal(k_w2, (hidden, num_classes), gain)
    b2 = jnp.zeros((num_classes,), jnp.float32)

    # One-time weight prep (hoisted out of the per-call path).  block_k=256
    # forces a multi-step K reduction at this toy width so the pl.when
    # init/accumulate/finalize path is exercised; real widths use the default.
    params, meta = prepare_head_params(w1, b1, w2, b2, block_k=256)
    params = jax.block_until_ready(params)

    # block_b=8 -> two batch tiles, exercising the parallel batch axis.
    out = jax.block_until_ready(cnnnet_head(x, params, meta, block_b=8))

    ref = _ref_head(x, w1, b1, w2, b2, jnp.bfloat16)
    assert out.shape == (B, num_classes)
    assert jnp.allclose(out, ref, atol=2e-3, rtol=2e-3), (
        float(jnp.max(jnp.abs(out - ref))))

    print("KERNEL_OK")
</pallas_src>

<mosaic_0001>
module attributes {stable_mosaic.version = 11 : i64} {
  func.func @_head_kernel(%arg0: i32, %arg1: i32, %arg2: memref<8x256xbf16, #tpu.memory_space<vmem>>, %arg3: memref<256x1024xbf16, #tpu.memory_space<vmem>>, %arg4: memref<1x1024xf32, #tpu.memory_space<vmem>>, %arg5: memref<1024x128xbf16, #tpu.memory_space<vmem>>, %arg6: memref<1x128xf32, #tpu.memory_space<vmem>>, %arg7: memref<8x128xf32, #tpu.memory_space<vmem>>, %arg8: memref<8x1024xf32, #tpu.memory_space<vmem>>) attributes {dimension_semantics = [#tpu.dimension_semantics<parallel>, #tpu.dimension_semantics<arbitrary>], iteration_bounds = array<i64: 2, 3>, scalar_prefetch = 0 : i64, scratch_operands = 1 : i64, tpu.core_type = #tpu.core_type<tc>, window_params = [{transform_indices = @transform_0, window_bounds = array<i64: 8, 256>}, {transform_indices = @transform_1, window_bounds = array<i64: 256, 1024>}, {pipeline_mode = #tpu.pipeline_mode<synchronous>, transform_indices = @transform_2, window_bounds = array<i64: 1, 1024>}, {pipeline_mode = #tpu.pipeline_mode<synchronous>, transform_indices = @transform_3, window_bounds = array<i64: 1024, 128>}, {pipeline_mode = #tpu.pipeline_mode<synchronous>, transform_indices = @transform_4, window_bounds = array<i64: 1, 128>}, {transform_indices = @transform_5, window_bounds = array<i64: 8, 128>}]} {
    %c0_i32 = arith.constant 0 : i32
    %0 = arith.cmpi eq, %arg1, %c0_i32 : i32
    %1 = arith.extui %0 : i1 to i32
    %c0_i32_0 = arith.constant 0 : i32
    %2 = arith.cmpi ne, %1, %c0_i32_0 : i32
    scf.if %2 {
      %cst_10 = arith.constant 0.000000e+00 : f32
      %14 = vector.broadcast %cst_10 : f32 to vector<8x1024xf32>
      %c0_11 = arith.constant 0 : index
      %c0_12 = arith.constant 0 : index
      %15 = vector.load %arg8[%c0_11, %c0_12] : memref<8x1024xf32, #tpu.memory_space<vmem>>, vector<8x1024xf32>
      tpu.vector_store %arg8[%c0_11, %c0_12], %14 {strides = array<i32>} : memref<8x1024xf32, #tpu.memory_space<vmem>>, vector<8x1024xf32>,
    } else {
    }
    %c0 = arith.constant 0 : index
    %c0_1 = arith.constant 0 : index
    %3 = vector.load %arg2[%c0, %c0_1] : memref<8x256xbf16, #tpu.memory_space<vmem>>, vector<8x256xbf16>
    %cst = arith.constant 0.000000e+00 : bf16
    %4 = vector.broadcast %cst : bf16 to vector<8x256xbf16>
    %5 = arith.maximumf %3, %4 : vector<8x256xbf16>
    %c0_2 = arith.constant 0 : index
    %c0_3 = arith.constant 0 : index
    %6 = vector.load %arg8[%c0_2, %c0_3] : memref<8x1024xf32, #tpu.memory_space<vmem>>, vector<8x1024xf32>
    %c0_4 = arith.constant 0 : index
    %c0_5 = arith.constant 0 : index
    %7 = vector.load %arg3[%c0_4, %c0_5] : memref<256x1024xbf16, #tpu.memory_space<vmem>>, vector<256x1024xbf16>
    %cst_6 = arith.constant dense<0.000000e+00> : vector<8x1024xf32>
    %8 = tpu.matmul %5, %7, %cst_6 {dimension_numbers = #tpu.dot_dimension_numbers<[1], [0], [0], [1], [0, 0, 1, 1], [], []>} : vector<8x256xbf16>, vector<256x1024xbf16>, vector<8x1024xf32> -> vector<8x1024xf32>
    %9 = arith.addf %6, %8 : vector<8x1024xf32>
    %c0_7 = arith.constant 0 : index
    %c0_8 = arith.constant 0 : index
    %10 = vector.load %arg8[%c0_7, %c0_8] : memref<8x1024xf32, #tpu.memory_space<vmem>>, vector<8x1024xf32>
    tpu.vector_store %arg8[%c0_7, %c0_8], %9 {strides = array<i32>} : memref<8x1024xf32, #tpu.memory_space<vmem>>, vector<8x1024xf32>,
    %c2_i32 = arith.constant 2 : i32
    %11 = arith.cmpi eq, %arg1, %c2_i32 : i32
    %12 = arith.extui %11 : i1 to i32
    %c0_i32_9 = arith.constant 0 : i32
    %13 = arith.cmpi ne, %12, %c0_i32_9 : i32
    scf.if %13 {
      %c0_10 = arith.constant 0 : index
      %c0_11 = arith.constant 0 : index
      %14 = vector.load %arg8[%c0_10, %c0_11] : memref<8x1024xf32, #tpu.memory_space<vmem>>, vector<8x1024xf32>
      %c0_12 = arith.constant 0 : index
      %c0_13 = arith.constant 0 : index
      %15 = vector.load %arg4[%c0_12, %c0_13] : memref<1x1024xf32, #tpu.memory_space<vmem>>, vector<1x1024xf32>
      %16 = vector.broadcast %15 : vector<1x1024xf32> to vector<8x1024xf32>
      %17 = arith.addf %14, %16 : vector<8x1024xf32>
      %cst_14 = arith.constant 0.000000e+00 : f32
      %18 = vector.broadcast %cst_14 : f32 to vector<8x1024xf32>
      %19 = arith.maximumf %17, %18 : vector<8x1024xf32>
      %20 = arith.truncf %19 : vector<8x1024xf32> to vector<8x1024xbf16>
      %c0_15 = arith.constant 0 : index
      %c0_16 = arith.constant 0 : index
      %21 = vector.load %arg5[%c0_15, %c0_16] : memref<1024x128xbf16, #tpu.memory_space<vmem>>, vector<1024x128xbf16>
      %cst_17 = arith.constant dense<0.000000e+00> : vector<8x128xf32>
      %22 = tpu.matmul %20, %21, %cst_17 {dimension_numbers = #tpu.dot_dimension_numbers<[1], [0], [0], [1], [0, 0, 1, 1], [], []>} : vector<8x1024xbf16>, vector<1024x128xbf16>, vector<8x128xf32> -> vector<8x128xf32>
      %c0_18 = arith.constant 0 : index
      %c0_19 = arith.constant 0 : index
      %23 = vector.load %arg6[%c0_18, %c0_19] : memref<1x128xf32, #tpu.memory_space<vmem>>, vector<1x128xf32>
      %24 = vector.broadcast %23 : vector<1x128xf32> to vector<8x128xf32>
      %25 = arith.addf %22, %24 : vector<8x128xf32>
      %c0_20 = arith.constant 0 : index
      %c0_21 = arith.constant 0 : index
      %26 = vector.load %arg7[%c0_20, %c0_21] : memref<8x128xf32, #tpu.memory_space<vmem>>, vector<8x128xf32>
      tpu.vector_store %arg7[%c0_20, %c0_21], %25 {strides = array<i32>} : memref<8x128xf32, #tpu.memory_space<vmem>>, vector<8x128xf32>,
    } else {
    }
    return
  }
  func.func @transform_0(%arg0: i32, %arg1: i32) -> (i32, i32) {
    %c0_i32 = arith.constant 0 : i32
    return %arg0, %arg1 : i32, i32
  }
  func.func @transform_1(%arg0: i32, %arg1: i32) -> (i32, i32) {
    %c0_i32 = arith.constant 0 : i32
    %c0_i32_0 = arith.constant 0 : i32
    return %arg1, %c0_i32 : i32, i32
  }
  func.func @transform_2(%arg0: i32, %arg1: i32) -> (i32, i32) {
    %c0_i32 = arith.constant 0 : i32
    %c0_i32_0 = arith.constant 0 : i32
    %c0_i32_1 = arith.constant 0 : i32
    return %c0_i32, %c0_i32_0 : i32, i32
  }
  func.func @transform_3(%arg0: i32, %arg1: i32) -> (i32, i32) {
    %c0_i32 = arith.constant 0 : i32
    %c0_i32_0 = arith.constant 0 : i32
    %c0_i32_1 = arith.constant 0 : i32
    return %c0_i32, %c0_i32_0 : i32, i32
  }
  func.func @transform_4(%arg0: i32, %arg1: i32) -> (i32, i32) {
    %c0_i32 = arith.constant 0 : i32
    %c0_i32_0 = arith.constant 0 : i32
    %c0_i32_1 = arith.constant 0 : i32
    return %c0_i32, %c0_i32_0 : i32, i32
  }
  func.func @transform_5(%arg0: i32, %arg1: i32) -> (i32, i32) {
    %c0_i32 = arith.constant 0 : i32
    %c0_i32_0 = arith.constant 0 : i32
    return %arg0, %c0_i32 : i32, i32
  }
}

</mosaic_0001>

<bundles_post_ra>
// kernel: tpu_custom_call.1
= control target key start
LH: loop header
LB: loop body
LE: loop exit
PB: predicated region body
PF: predicated region fallthrough
CT: control target
= control target key end

     0   :  { %s4287_s0 = inlined_call_operand.hbm [shape: bf16[16,768], index: 0, kind: input, shape index: {}]   ;;  %s4288_s1 = inlined_call_operand.hbm [shape: bf16[768,1024], index: 1, kind: input, shape index: {}]   ;;  %s4289_s2 = inlined_call_operand.hbm [shape: f32[1,1024], index: 2, kind: input, shape index: {}]   ;;  %s4290_s3 = inlined_call_operand.hbm [shape: bf16[1024,128], index: 3, kind: input, shape index: {}]   ;;  %s4291_s4 = inlined_call_operand.hbm [shape: f32[1,128], index: 4, kind: input, shape index: {}]   ;;  %s4292_s5 = inlined_call_operand.hbm [shape: f32[16,128], index: 5, kind: output, shape index: {}]  }
   0x1   :  { %4303 = sst [smem:[#allocation31_spill]] %s4289_s2 }
   0x2   :  { %4304 = sst [smem:[#allocation32_spill]] %s4290_s3 }
   0x3   :  { %4305 = sst [smem:[#allocation33_spill]] %s4291_s4 }
   0x4   :  { %4306 = sst [smem:[#allocation34_spill]] %s4292_s5 }
   0x5   :  { %10 = vsyncpa [#allocation4], 0 }
   0x6   :  { %12 = vsyncpa [#allocation4 + $0x1], 0 }
   0x7   :  { %13 = vsyncpa [#allocation7], 0 }
   0x8   :  { %15 = vsyncpa [#allocation7 + $0x1], 0 }
   0x9   :  { %16 = vsyncpa [#allocation10], 0 }
   0xa   :  { %17 = vsyncpa [#allocation5], 0 }
   0xb   :  { %19 = vsyncpa [#allocation5 + $0x1], 0  ;;  %s3700_s18 = smov 0   ;;  %s3702_s19 = smov 0  }
   0xc   :  { %s3704_s20 = smov 0   ;;  %s3706_s21 = smov 0  }
   0xd   :  { %s3708_s22 = smov 0   ;;  %s3710_s23 = smov 0  }
   0xe   :  { %s3712_s24 = smov 0   ;;  %s3714_s25 = smov 0  }
   0xf   :  { %s3716_s26 = smov 0   ;;  %s3718_s27 = smov 0  }
  0x10   :  { %s3720_s28 = smov 0   ;;  %s3722_s29 = smov 0  }
  0x11   :  { %s3724_s30 = smov 0   ;;  %s3726_s6 = smov 0  }
  0x12 LB: > { %4307 = sst [smem:[#allocation18_spill]] %s3608_s18  ;;  %s3769_s7 = sadd.s32 4294967295, %s3660_s6   ;;  %s3660_s6 = sphi %s3726_s6, %s25_s6   ;;  %s3656_s30 = sphi %s3724_s30, %s4347_s30   ;;  %s3652_s29 = sphi %s3722_s29, %s4357_s29   ;;  %s3648_s28 = sphi %s3720_s28, %s4356_s28   ;;  %s3644_s27 = sphi %s3718_s27, %s4355_s27   ;;  %s3640_s26 = sphi %s3716_s26, %s4344_s26   ;;  %s3636_s25 = sphi %s3714_s25, %s4354_s25   ;;  %s3632_s24 = sphi %s3712_s24, %s4353_s24   ;;  %s3628_s23 = sphi %s3710_s23, %s4352_s23   ;;  %s3624_s22 = sphi %s3708_s22, %s4351_s22   ;;  %s3620_s21 = sphi %s3706_s21, %s4350_s21   ;;  %s3616_s20 = sphi %s3704_s20, %s4341_s20   ;;  %s3612_s19 = sphi %s3702_s19, %s4349_s19   ;;  %s3608_s18 = sphi %s3700_s18, %s4348_s18  }
  0x13   : > { %4308 = sst [smem:[#allocation19_spill]] %s3616_s20  ;;  %s2195_s8 = sadd.s32 4294967294, %s3660_s6  }
  0x14   : > { %4309 = sst [smem:[#allocation20_spill]] %s3640_s26  ;;  %p60_p0 = scmp.eq.s32.totalorder %s3769_s7, 0 }
  0x15   : > { %4310 = sst [smem:[#allocation21_spill]] %s3644_s27  ;;  %p85_p1 = scmp.ne.s32.totalorder %s3624_s22, %s3620_s21 }
  0x16   : > { %4311 = sst [smem:[#allocation22_spill]] %s3648_s28  ;;  %p171_p2 = scmp.ne.s32.totalorder %s3616_s20, %s3612_s19 }
  0x17   : > { %4312 = sst [smem:[#allocation23_spill]] %s3656_s30  ;;  %p172_p3 = scmp.eq.s32.totalorder %s3769_s7, 5 }
  0x18   : > { %p3779_p4 = por %p85_p1, %p60_p0  ;;  %p177_p5 = scmp.ne.s32.totalorder %s3612_s19, %s3608_s18 }
  0x19   : > { %p3785_p6 = por %p172_p3, %p171_p2  ;;  %p178_p7 = scmp.eq.s32.totalorder %s2195_s8, 5 }
  0x1a   : > { %p2196_p8 = scmp.ge.s32.totalorder %s3660_s6, 1  ;;  %p185_p9 = scmp.lt.s32.totalorder %s3660_s6, 7 }
  0x1b   : > { %s4314_s10 = scalar_select %p3785_p6, 1, 0 }
  0x1c   : > { %p3791_p10 = por %p178_p7, %p177_p5  ;;  %p3795_p11 = pnand %p2196_p8, %p185_p9 }
  0x1d   : > { %4315 = sst [smem:[#allocation24_spill]] %s4314_s10  ;;  %s3662_s16 = smov [#allocation8]  }
  0x1e   : > { %s4316_s11 = scalar_select %p3791_p10, 1, 0 }
  0x1f   : > { %s4319_s2 = sld [smem:[#allocation31_spill]]  ;;  %p3202_p12 = pneg %p3795_p11 }
  0x20   : > { %4317 = sst [smem:[#allocation25_spill]] %s4316_s11  ;;  %s199_s17 = sshll.u32 %s3662_s16, 4  ;;  %s200_s17 = int_to_ptr.vmem [resolvable:$true] %s199_s17 }
  0x21   : > { %p3806_p13 = pnand %p3202_p12, %p60_p0  ;;  %s4321_s3 = sld [smem:[#allocation32_spill]] }
  0x22   : > { %s3663_s14 = smov [#allocation9]   ;;  %s4322_s4 = sld [smem:[#allocation33_spill]] }
  0x23   : > { %s3664_s8 = smov 64   ;;  %s3665_s5 = smov 4  }
  0x24   : > { %s37_s18 = sadd.s32 1, %s3656_s30  ;;  %p53_p2 = scmp.ne.s32.totalorder %s3640_s26, %s3636_s25 }
  0x25   : > { %s197_s15 = sshll.u32 %s4319_s2, 4  ;;  %s210_s2 = sshll.u32 %s3663_s14, 4  ;;  %s198_s15 = int_to_ptr.hbm [resolvable:$true] %s197_s15  ;;  %s211_s2 = int_to_ptr.vmem [resolvable:$true] %s210_s2 }
  0x26   : > { %3205 = dma.hbm_to_vmem [thread:$0]  (!%p3806_p13), %s198_s15, 128, %s200_s17, [#allocation7]  }
  0x27   : > { %s208_s13 = sshll.u32 %s4321_s3, 4  ;;  %s3666_s14 = smov [#allocation11]   ;;  %s209_s13 = int_to_ptr.hbm [resolvable:$true] %s208_s13 }
  0x28   : > { %s223_s11 = sshll.u32 %s4322_s4, 4  ;;  %s225_s3 = sshll.u32 %s3666_s14, 4  ;;  %s224_s11 = int_to_ptr.hbm [resolvable:$true] %s223_s11  ;;  %s226_s3 = int_to_ptr.vmem [resolvable:$true] %s225_s3 }
  0x29   : > { %3208 = dma.hbm_to_vmem [thread:$0]  (!%p3806_p13), %s209_s13, 8192, %s211_s2, [#allocation10], %s3664_s8, %s3664_s8, %s3665_s5  }
  0x2a   : > { %3211 = dma.hbm_to_vmem [thread:$0]  (!%p3806_p13), %s224_s11, 16, %s226_s3, [#allocation10]  }
  0x2b   : > { %s34_s15 = sadd.s32 1, %s3652_s29  ;;  %s46_s17 = sadd.s32 1, %s3640_s26 }
  0x2c   : > { %p35_p1 = scmp.ge.s32.totalorder %s34_s15, 3  ;;  %p54_p3 = scmp.eq.s32.totalorder %s3660_s6, 0 }
  0x2d   : > { %p59_p8 = scmp.ne.s32.totalorder %s3636_s25, %s3632_s24  ;;  %s72_s5 = sadd.s32 1, %s3628_s23 }
  0x2e   : > { %s4359_s15 = smov (%p35_p1, %s34_s15), 0  ;;  %s4361_s18 = smov (!%p35_p1, %s37_s18), %s3656_s30 }
  0x2f   : > { %4323 = sst [smem:[#allocation26_spill]] %s4359_s15  ;;  %s42_s2 = ssub.s32 %s3652_s29, %s4359_s15 }
  0x30   : > { %p3835_p5 = por %p54_p3, %p53_p2  ;;  %p39_p7 = scmp.ge.s32.totalorder %s4361_s18, 2 }
  0x31   : > { %p70_p9 = scmp.eq.s32.totalorder %s42_s2, 0  ;;  %p3846_p12 = por %p60_p0, %p59_p8 }
  0x32   : > { %s4363_s18 = smov (%p39_p7, %s4361_s18), 0  ;;  %p79_p13 = scmp.ne.s32.totalorder %s3628_s23, %s3624_s22 }
  0x33   : > { %4325 = sst [smem:[#allocation27_spill]] %s4363_s18  ;;  %s41_s13 = ssub.s32 %s3656_s30, %s4363_s18 }
  0x34   : > { %s161_s16 = sadd.s32 1, %s3616_s20  ;;  %s43_s11 = sor.u32 %s42_s2, %s41_s13 }
  0x35   : > { %p3857_p1 = por %p79_p13, %p54_p3  ;;  %p44_p2 = scmp.eq.s32.totalorder %s43_s11, 0 }
  0x36   : > { %p159_p7 = scmp.eq.s32.totalorder %s41_s13, 0  ;;  %p3226_p8 = scmp.lt.s32.totalorder %s3660_s6, 6 }
  0x37   : > { %s3862_s8 = scalar_select %p70_p9, %s3628_s23, %s72_s5  }
  0x38   : > { %s3865_s14 = scalar_select %p44_p2, %s3640_s26, %s46_s17  }
  0x39   : > { %4328 = sst [smem:[#allocation28_spill]] %s3862_s8  ;;  %s236_s18 = sand.u32 1, %s3640_s26  }
  0x3a   : > { %4329 = sst [smem:[#allocation29_spill]] %s3865_s14  ;;  %s2201_s15 = sshll.u32 %s236_s18, 3 }
  0x3b   : > { %s3868_s4 = scalar_select %p159_p7, %s3616_s20, %s161_s16  }
  0x3c   : > { %s2202_s2 = sshll.u32 %s3652_s29, 1  ;;  %s3183_s10 = smul.u32 6, %s3656_s30 }
  0x3d   : > { %4330 = sst [smem:[#allocation30_spill]] %s3868_s4  ;;  %s240_s28 = scalar_lea.vmem [#allocation3], %s2201_s15 }
  0x3e   : > { %s251_s27 = sshll.u32 %s240_s28, 4  ;;  %p3213_p3 = pnand %p3226_p8, %p3835_p5  ;;  %s252_s27 = int_to_ptr.vmem [resolvable:$true] %s251_s27 }
  0x3f   : > { %s245_s13 = sadd.s32 %s3183_s10, %s2202_s2  ;;  %p3878_p9 = pnand %p3226_p8, %p3857_p1 }
  0x40   : > { %s2203_s5 = sshll.u32 %s245_s13, 2  ;;  %s258_s8 = sand.u32 1, %s3660_s6  }
  0x41   : > { %s247_s14 = scalar_lea.hbm %s4287_s0, %s2203_s5  ;;  %s237_s15 = scalar_lea.sflag [#allocation4], %s236_s18 }
  0x42   : > { %s249_s26 = sshll.u32 %s247_s14, 4  ;;  %s260_s28 = sand.u32 1, %s3628_s23   ;;  %s250_s26 = int_to_ptr.hbm [resolvable:$true] %s249_s26 }
  0x43   : > { %3215 = dma.hbm_to_vmem [thread:$0]  (!%p3213_p3), %s250_s26, 128, %s252_s27, %s237_s15  }
  0x44   : > { %s2990_s3 = sshll.u32 %s3652_s29, 10  ;;  %s2204_s30 = sshll.u32 %s260_s28, 10 }
  0x45   : > { %s268_s2 = scalar_lea.hbm %s4288_s1, %s2990_s3  ;;  %s262_s13 = scalar_lea.vmem [#allocation6], %s2204_s30 }
  0x46   : > { %s269_s4 = sshll.u32 %s268_s2, 4  ;;  %s271_s20 = sshll.u32 %s262_s13, 4  ;;  %s270_s4 = int_to_ptr.hbm [resolvable:$true] %s269_s4  ;;  %s272_s20 = int_to_ptr.vmem [resolvable:$true] %s271_s20 }
  0x47   : > { %s259_s16 = scalar_lea.sflag [#allocation7], %s258_s8  ;;  %s3667_s5 = smov 512  }
  0x48   : > { %s3668_s14 = smov 32   ;;  %283 = sbr.rel (%p3795_p11) target bundleno = 609 (0x261), region = 40 }
  0x49   : > { %3218 = dma.hbm_to_vmem [thread:$0]  (!%p3878_p9), %s270_s4, 16384, %s272_s20, %s259_s16, %s3667_s5, %s3667_s5, %s3668_s14  }
  0x4a   : > { %s285_s26 = sand.u32 (!%p3795_p11), 1, %s3636_s25  }
  0x4b   : > { %s3896_s27 = sshll.u32 (!%p3795_p11), %s285_s26, 3  ;;  %s286_s18 = scalar_lea.sflag (!%p3795_p11), [#allocation4], %s285_s26 }
  0x4c   : > { %s289_s11 = scalar_lea.vmem (!%p3795_p11), [#allocation3], %s3896_s27 }
  0x4d   : > { %3587 = dma.done.wait (%p3846_p12), %s286_s18, 128  }
  0x4e   : > { %3589 = vsyncadd (%p3846_p12), %s286_s18, 4294967168  ;;  %s295_s4 = sand.u32 1, %s3769_s7   ;;  %s297_s20 = sand.u32 1, %s3624_s22  }
  0x4f   : > { %s2210_s30 = sshll.u32 %s297_s20, 10  ;;  %s296_s12 = scalar_lea.sflag [#allocation7], %s295_s4 }
  0x50   : > { %s3905_s8 = scalar_lea.vmem [#allocation6], %s2210_s30 }
  0x51   : > { %3591 = dma.done.wait (%p3779_p4), %s296_s12, 16384  }
  0x52   : > { %3593 = vsyncadd (%p3779_p4), %s296_s12, 4294950912 }
  0x53   : > { %3595 = dma.done.wait (%p60_p0), [#allocation7], 128  }
  0x54   : > { %3597 = vsyncadd (%p60_p0), [#allocation7], 4294967168 }
  0x55   : > { %3599 = dma.done.wait (%p60_p0), [#allocation10], 8208  }
  0x56   : > { %3601 = vsyncadd (%p60_p0), [#allocation10], 4294959088  ;;  %s344_s21 = sand.u32 1, %s3612_s19   ;;  %s4332_s15 = sld [smem:[#allocation21_spill]] }
  0x57   : > { %s3922_s17 = sshll.u32 %s344_s21, 3 }
  0x58   : > { %s346_s9 = scalar_lea.vmem [#allocation12], %s3922_s17 }
  0x5c   : > { %p2215_p4 = scmp.ne.s32.totalorder %s4332_s15, 0 }
  0x5e   : > { %352 = sbr.rel (%p2215_p4) target bundleno = 108 (0x6c), region = 64 }
  0x63   : > { %v3669_v0 = vmov 0.0  }
  0x64   : > { %353 = vst [vmem:[#allocation2 + $0x30] sm:$0xff] %v3669_v0 }
  0x65   : > { %354 = vst [vmem:[#allocation2] sm:$0xff] %v3669_v0 }
  0x66   : > { %355 = vst [vmem:[#allocation2 + $0x18] sm:$0xff] %v3669_v0 }
  0x67   : > { %356 = vst [vmem:[#allocation2 + $0x10] sm:$0xff] %v3669_v0 }
  0x68   : > { %357 = vst [vmem:[#allocation2 + $0x8] sm:$0xff] %v3669_v0 }
  0x69   : > { %358 = vst [vmem:[#allocation2 + $0x20] sm:$0xff] %v3669_v0 }
  0x6a   : > { %359 = vst [vmem:[#allocation2 + $0x28] sm:$0xff] %v3669_v0 }
  0x6b   : > { %360 = vst [vmem:[#allocation2 + $0x38] sm:$0xff] %v3669_v0 }
  0x6c PF: > { %v2442_v1 = vld [vmem:[%s3905_s8 + $0x1c0] sm:$0xf]  ;;  %v3047_v6 = vld [vmem:[%s3905_s8 + $0x1c4] sm:$0xf]  ;;  %s4333_s7 = sld [smem:[#allocation21_spill]] }
  0x6d   : > { %v3051_v2 = vld [vmem:[%s3905_s8 + $0x1dc] sm:$0xf0]  ;;  %v2444_v7 = vld [vmem:[%s3905_s8 + $0x1e0] sm:$0xf0] }
  0x6e   : > { %v2698_v3 = vld [vmem:[%s3905_s8 + $0x3c0] sm:$0xf]  ;;  %v2443_v4 = vor.u32 %v3051_v2, %v2442_v1  ;;  %v2447_v9 = vor.u32 %v3047_v6, %v2444_v7  ;;  %v3111_v10 = vld [vmem:[%s3905_s8 + $0x3c4] sm:$0xf] }
  0x6f   : > { %v3115_v5 = vld [vmem:[%s3905_s8 + $0x3dc] sm:$0xf0]  ;;  %v2700_v11 = vld [vmem:[%s3905_s8 + $0x3e0] sm:$0xf0] }
  0x70   : > { %v2699_v8 = vor.u32 %v3115_v5, %v2698_v3  ;;  %v2410_v12 = vld [vmem:[%s3905_s8 + $0x180] sm:$0xf]  ;;  %1144 = vmatpush.bf16.msra.mxu0 %v2443_v4  ;;  %v2703_v13 = vor.u32 %v3111_v10, %v2700_v11  ;;  %1170 = vmatpush.bf16.msra.mxu2 %v2447_v9  ;;  %v3039_v19 = vld [vmem:[%s3905_s8 + $0x184] sm:$0xf] }
  0x71   : > { %v3043_v14 = vld [vmem:[%s3905_s8 + $0x19c] sm:$0xf0]  ;;  %v2412_v20 = vld [vmem:[%s3905_s8 + $0x1a0] sm:$0xf0] }
  0x72   : > { %v2666_v15 = vld [vmem:[%s3905_s8 + $0x380] sm:$0xf]  ;;  %1157 = vmatpush.bf16.msra.mxu1 %v2699_v8  ;;  %v2411_v17 = vor.u32 %v3043_v14, %v2410_v12  ;;  %v3103_v21 = vld [vmem:[%s3905_s8 + $0x384] sm:$0xf]  ;;  %1183 = vmatpush.bf16.msra.mxu3 %v2703_v13  ;;  %v2415_v22 = vor.u32 %v3039_v19, %v2412_v20  ;;  %p2728_p0 = scmp.ne.s32.totalorder %s4333_s7, 2 }
  0x73   : > { %v3107_v16 = vld [vmem:[%s3905_s8 + $0x39c] sm:$0xf0]  ;;  %v2668_v23 = vld [vmem:[%s3905_s8 + $0x3a0] sm:$0xf0] }
  0x74   : > { %v2667_v18 = vor.u32 %v3107_v16, %v2666_v15  ;;  %v2378_v24 = vld [vmem:[%s3905_s8 + $0x140] sm:$0xf]  ;;  %v2671_v26 = vor.u32 %v3103_v21, %v2668_v23  ;;  %v3031_v29 = vld [vmem:[%s3905_s8 + $0x144] sm:$0xf]  ;;  %1145 = vmatpush.bf16.msra.mxu0 %v2411_v17  ;;  %1171 = vmatpush.bf16.msra.mxu2 %v2415_v22 }
  0x75   : > { %v3035_v25 = vld [vmem:[%s3905_s8 + $0x15c] sm:$0xf0]  ;;  %v2380_v31 = vld [vmem:[%s3905_s8 + $0x160] sm:$0xf0] }
  0x76   : > { %v2634_v27 = vld [vmem:[%s3905_s8 + $0x340] sm:$0xf]  ;;  %v2379_v30 = vor.u32 %v3035_v25, %v2378_v24  ;;  %v3095_v32 = vld [vmem:[%s3905_s8 + $0x344] sm:$0xf]  ;;  %1158 = vmatpush.bf16.msra.mxu1 %v2667_v18  ;;  %v2383_v35 = vor.u32 %v3031_v29, %v2380_v31  ;;  %1184 = vmatpush.bf16.msra.mxu3 %v2671_v26  ;;  %v2450_v29 = vld [vmem:[%s3905_s8 + $0x1c8] sm:$0xf] }
  0x77   : > { %v3099_v28 = vld [vmem:[%s3905_s8 + $0x35c] sm:$0xf0]  ;;  %v2636_v33 = vld [vmem:[%s3905_s8 + $0x360] sm:$0xf0]  ;;  %v2706_v31 = vld [vmem:[%s3905_s8 + $0x3c8] sm:$0xf] }
  0x78   : > { %v2635_v34 = vor.u32 %v3099_v28, %v2634_v27  ;;  %v2346_v36 = vld [vmem:[%s3905_s8 + $0x100] sm:$0xf]  ;;  %v2639_v39 = vor.u32 %v3095_v32, %v2636_v33  ;;  %v3023_v41 = vld [vmem:[%s3905_s8 + $0x104] sm:$0xf]  ;;  %1146 = vmatpush.bf16.msra.mxu0 %v2379_v30  ;;  %1172 = vmatpush.bf16.msra.mxu2 %v2383_v35  ;;  %v3052_v30 = vld [vmem:[%s3905_s8 + $0x1e4] sm:$0xf0] }
  0x79   : > { %v3027_v37 = vld [vmem:[%s3905_s8 + $0x11c] sm:$0xf0]  ;;  %v2348_v42 = vld [vmem:[%s3905_s8 + $0x120] sm:$0xf0]  ;;  %v3116_v33 = vld [vmem:[%s3905_s8 + $0x3e4] sm:$0xf0] }
  0x7a   : > { %v2602_v38 = vld [vmem:[%s3905_s8 + $0x300] sm:$0xf]  ;;  %v3087_v43 = vld [vmem:[%s3905_s8 + $0x304] sm:$0xf]  ;;  %v2347_v45 = vor.u32 %v3027_v37, %v2346_v36  ;;  %1159 = vmatpush.bf16.msra.mxu1 %v2635_v34  ;;  %v2351_v47 = vor.u32 %v3023_v41, %v2348_v42  ;;  %1185 = vmatpush.bf16.msra.mxu3 %v2639_v39  ;;  %v3048_v34 = vld [vmem:[%s3905_s8 + $0x1cc] sm:$0xf]  ;;  %v2451_v41 = vor.u32 %v3052_v30, %v2450_v29 }
  0x7b   : > { %v3091_v40 = vld [vmem:[%s3905_s8 + $0x31c] sm:$0xf0]  ;;  %v2604_v44 = vld [vmem:[%s3905_s8 + $0x320] sm:$0xf0]  ;;  %v2452_v35 = vld [vmem:[%s3905_s8 + $0x1e8] sm:$0xf0]  ;;  %v2707_v42 = vor.u32 %v3116_v33, %v2706_v31 }
  0x7c   : > { %v2603_v46 = vor.u32 %v3091_v40, %v2602_v38  ;;  %v2314_v48 = vld [vmem:[%s3905_s8 + $0xc0] sm:$0xf]  ;;  %v2607_v51 = vor.u32 %v3087_v43, %v2604_v44  ;;  %v3015_v53 = vld [vmem:[%s3905_s8 + $0xc4] sm:$0xf]  ;;  %1147 = vmatpush.bf16.msra.mxu0 %v2347_v45  ;;  %1173 = vmatpush.bf16.msra.mxu2 %v2351_v47  ;;  %v3112_v38 = vld [vmem:[%s3905_s8 + $0x3cc] sm:$0xf]  ;;  %v2455_v43 = vor.u32 %v3048_v34, %v2452_v35 }
  0x7d   : > { %v3019_v49 = vld [vmem:[%s3905_s8 + $0xdc] sm:$0xf0]  ;;  %v2316_v54 = vld [vmem:[%s3905_s8 + $0xe0] sm:$0xf0]  ;;  %v2708_v39 = vld [vmem:[%s3905_s8 + $0x3e8] sm:$0xf0] }
  0x7e   : > { %v2570_v50 = vld [vmem:[%s3905_s8 + $0x2c0] sm:$0xf]  ;;  %v3079_v55 = vld [vmem:[%s3905_s8 + $0x2c4] sm:$0xf]  ;;  %v2315_v57 = vor.u32 %v3019_v49, %v2314_v48  ;;  %1160 = vmatpush.bf16.msra.mxu1 %v2603_v46  ;;  %v2319_v59 = vor.u32 %v3015_v53, %v2316_v54  ;;  %1186 = vmatpush.bf16.msra.mxu3 %v2607_v51  ;;  %v2418_v44 = vld [vmem:[%s3905_s8 + $0x188] sm:$0xf]  ;;  %v2711_v47 = vor.u32 %v3112_v38, %v2708_v39 }
  0x7f   : > { %v3083_v52 = vld [vmem:[%s3905_s8 + $0x2dc] sm:$0xf0]  ;;  %v2572_v56 = vld [vmem:[%s3905_s8 + $0x2e0] sm:$0xf0]  ;;  %v3044_v45 = vld [vmem:[%s3905_s8 + $0x1a4] sm:$0xf0] }
  0x80   : > { %v2571_v58 = vor.u32 %v3083_v52, %v2570_v50  ;;  %v2282_v60 = vld [vmem:[%s3905_s8 + $0x80] sm:$0xf]  ;;  %v2575_v63 = vor.u32 %v3079_v55, %v2572_v56  ;;  %v3007_v1 = vld [vmem:[%s3905_s8 + $0x84] sm:$0xf]  ;;  %1148 = vmatpush.bf16.msra.mxu0 %v2315_v57  ;;  %1174 = vmatpush.bf16.msra.mxu2 %v2319_v59  ;;  %v2674_v46 = vld [vmem:[%s3905_s8 + $0x388] sm:$0xf]  ;;  %v2419_v53 = vor.u32 %v3044_v45, %v2418_v44 }
  0x81   : > { %v3011_v61 = vld [vmem:[%s3905_s8 + $0x9c] sm:$0xf0]  ;;  %v2284_v2 = vld [vmem:[%s3905_s8 + $0xa0] sm:$0xf0]  ;;  %v3108_v48 = vld [vmem:[%s3905_s8 + $0x3a4] sm:$0xf0] }
  0x82   : > { %v2538_v62 = vld [vmem:[%s3905_s8 + $0x280] sm:$0xf]  ;;  %v3071_v3 = vld [vmem:[%s3905_s8 + $0x284] sm:$0xf]  ;;  %v2283_v5 = vor.u32 %v3011_v61, %v2282_v60  ;;  %1161 = vmatpush.bf16.msra.mxu1 %v2571_v58  ;;  %v2287_v7 = vor.u32 %v3007_v1, %v2284_v2  ;;  %1187 = vmatpush.bf16.msra.mxu3 %v2575_v63  ;;  %v3040_v49 = vld [vmem:[%s3905_s8 + $0x18c] sm:$0xf]  ;;  %v2675_v54 = vor.u32 %v3108_v48, %v2674_v46 }
  0x83   : > { %v3075_v0 = vld [vmem:[%s3905_s8 + $0x29c] sm:$0xf0]  ;;  %v2540_v4 = vld [vmem:[%s3905_s8 + $0x2a0] sm:$0xf0]  ;;  %v2420_v50 = vld [vmem:[%s3905_s8 + $0x1a8] sm:$0xf0] }
  0x84   : > { %v2539_v6 = vor.u32 %v3075_v0, %v2538_v62  ;;  %v2250_v8 = vld [vmem:[%s3905_s8 + $0x40] sm:$0xf]  ;;  %v2543_v11 = vor.u32 %v3071_v3, %v2540_v4  ;;  %v2999_v13 = vld [vmem:[%s3905_s8 + $0x44] sm:$0xf]  ;;  %1149 = vmatpush.bf16.msra.mxu0 %v2283_v5  ;;  %1175 = vmatpush.bf16.msra.mxu2 %v2287_v7  ;;  %v3104_v51 = vld [vmem:[%s3905_s8 + $0x38c] sm:$0xf]  ;;  %v2423_v55 = vor.u32 %v3040_v49, %v2420_v50 }
  0x85   : > { %v3003_v9 = vld [vmem:[%s3905_s8 + $0x5c] sm:$0xf0]  ;;  %v2252_v14 = vld [vmem:[%s3905_s8 + $0x60] sm:$0xf0]  ;;  %v2676_v52 = vld [vmem:[%s3905_s8 + $0x3a8] sm:$0xf0] }
  0x86   : > { %v2506_v10 = vld [vmem:[%s3905_s8 + $0x240] sm:$0xf]  ;;  %v3063_v15 = vld [vmem:[%s3905_s8 + $0x244] sm:$0xf]  ;;  %v2251_v17 = vor.u32 %v3003_v9, %v2250_v8  ;;  %1162 = vmatpush.bf16.msra.mxu1 %v2539_v6  ;;  %v2255_v21 = vor.u32 %v2999_v13, %v2252_v14  ;;  %1188 = vmatpush.bf16.msra.mxu3 %v2543_v11  ;;  %v2386_v56 = vld [vmem:[%s3905_s8 + $0x148] sm:$0xf]  ;;  %v2679_v59 = vor.u32 %v3104_v51, %v2676_v52 }
  0x87   : > { %v3067_v12 = vld [vmem:[%s3905_s8 + $0x25c] sm:$0xf0]  ;;  %v2508_v16 = vld [vmem:[%s3905_s8 + $0x260] sm:$0xf0]  ;;  %v3036_v57 = vld [vmem:[%s3905_s8 + $0x164] sm:$0xf0] }
  0x88   : > { %v2218_v18 = vld [vmem:[%s3905_s8] sm:$0xf]  ;;  %v2507_v20 = vor.u32 %v3067_v12, %v2506_v10  ;;  %v2991_v24 = vld [vmem:[%s3905_s8 + $0x4] sm:$0xf]  ;;  %v2511_v25 = vor.u32 %v3063_v15, %v2508_v16  ;;  %1150 = vmatpush.bf16.msra.mxu0 %v2251_v17  ;;  %1176 = vmatpush.bf16.msra.mxu2 %v2255_v21  ;;  %v2642_v58 = vld [vmem:[%s3905_s8 + $0x348] sm:$0xf]  ;;  %v2387_v1 = vor.u32 %v3036_v57, %v2386_v56 }
  0x89   : > { %v2995_v19 = vld [vmem:[%s3905_s8 + $0x1c] sm:$0xf0]  ;;  %v2220_v26 = vld [vmem:[%s3905_s8 + $0x20] sm:$0xf0]  ;;  %v3100_v60 = vld [vmem:[%s3905_s8 + $0x364] sm:$0xf0] }
  0x8a   : > { %v2474_v22 = vld [vmem:[%s3905_s8 + $0x200] sm:$0xf]  ;;  %v3055_v27 = vld [vmem:[%s3905_s8 + $0x204] sm:$0xf]  ;;  %v2219_v32 = vor.u32 %v2995_v19, %v2218_v18  ;;  %1163 = vmatpush.bf16.msra.mxu1 %v2507_v20  ;;  %v2223_v37 = vor.u32 %v2991_v24, %v2220_v26  ;;  %1189 = vmatpush.bf16.msra.mxu3 %v2511_v25  ;;  %v3032_v61 = vld [vmem:[%s3905_s8 + $0x14c] sm:$0xf]  ;;  %v2643_v4 = vor.u32 %v3100_v60, %v2642_v58 }
  0x8b   : > { %v3059_v23 = vld [vmem:[%s3905_s8 + $0x21c] sm:$0xf0]  ;;  %v2476_v28 = vld [vmem:[%s3905_s8 + $0x220] sm:$0xf0]  ;;  %v2388_v62 = vld [vmem:[%s3905_s8 + $0x168] sm:$0xf0] }
  0x8c   : > { %v2475_v36 = vor.u32 %v3059_v23, %v2474_v22  ;;  %v2479_v40 = vor.u32 %v3055_v27, %v2476_v28  ;;  %1151 = vmatpush.bf16.msra.mxu0 %v2219_v32  ;;  %1177 = vmatpush.bf16.msra.mxu2 %v2223_v37  ;;  %v3096_v63 = vld [vmem:[%s3905_s8 + $0x34c] sm:$0xf]  ;;  %v2354_v2 = vld [vmem:[%s3905_s8 + $0x108] sm:$0xf]  ;;  %v361_v3 = vld [vmem:[%s289_s11] sm:$0xff]  ;;  %v2391_v5 = vor.u32 %v3032_v61, %v2388_v62 }
  0x8d   : > { %v2644_v0 = vld [vmem:[%s3905_s8 + $0x368] sm:$0xf0]  ;;  %v3028_v6 = vld [vmem:[%s3905_s8 + $0x124] sm:$0xf0]  ;;  %v362_v9 = vunpack.c.l.bf16 %v361_v3  ;;  %v363_v10 = vunpack.c.h.bf16 %v361_v3 }
  0x8e   : > { %1164 = vmatpush.bf16.msra.mxu1 %v2475_v36  ;;  %1190 = vmatpush.bf16.msra.mxu3 %v2479_v40  ;;  %v2610_v7 = vld [vmem:[%s3905_s8 + $0x308] sm:$0xf]  ;;  %v2647_v11 = vor.u32 %v3096_v63, %v2644_v0  ;;  %v3024_v12 = vld [vmem:[%s3905_s8 + $0x10c] sm:$0xf]  ;;  %v2355_v18 = vor.u32 %v3028_v6, %v2354_v2  ;;  %v2714_v6 = vld [vmem:[%s3905_s8 + $0x3d0] sm:$0xf] }
  0x8f   : > { %v3092_v8 = vld [vmem:[%s3905_s8 + $0x324] sm:$0xf0]  ;;  %v2356_v13 = vld [vmem:[%s3905_s8 + $0x128] sm:$0xf0]  ;;  %v364_v16 = vmax.f32 %v362_v9, 0.0  ;;  %v365_v17 = vmax.f32 %v363_v10, 0.0 }
  0x90   : > { %1196 = vmatpush.bf16.msrb.mxu0 %v2451_v41  ;;  %1222 = vmatpush.bf16.msrb.mxu2 %v2455_v43  ;;  %v3088_v14 = vld [vmem:[%s3905_s8 + $0x30c] sm:$0xf]  ;;  %v2611_v19 = vor.u32 %v3092_v8, %v2610_v7  ;;  %v2359_v20 = vor.u32 %v3024_v12, %v2356_v13  ;;  %v2322_v21 = vld [vmem:[%s3905_s8 + $0xc8] sm:$0xf]  ;;  %v3117_v8 = vld [vmem:[%s3905_s8 + $0x3ec] sm:$0xf0] }
  0x91   : > { %v2612_v15 = vld [vmem:[%s3905_s8 + $0x328] sm:$0xf0]  ;;  %v3020_v22 = vld [vmem:[%s3905_s8 + $0xe4] sm:$0xf0]  ;;  %v4027_v24 = vpack.c.bf16 %v364_v16, %v364_v16  ;;  %v4029_v25 = vpack.c.bf16 %v365_v17, %v365_v17  ;;  %v3049_v9 = vld [vmem:[%s3905_s8 + $0x1d4] sm:$0xf]  ;;  %v2715_v17 = vor.u32 %v3117_v8, %v2714_v6 }
  0x92   : > { %1209 = vmatpush.bf16.msrb.mxu1 %v2707_v42  ;;  %1235 = vmatpush.bf16.msrb.mxu3 %v2711_v47  ;;  %v2578_v23 = vld [vmem:[%s3905_s8 + $0x2c8] sm:$0xf]  ;;  %v2615_v26 = vor.u32 %v3088_v14, %v2612_v15  ;;  %v3016_v28 = vld [vmem:[%s3905_s8 + $0xcc] sm:$0xf]  ;;  %v2323_v32 = vor.u32 %v3020_v22, %v2322_v21  ;;  %v2460_v10 = vld [vmem:[%s3905_s8 + $0x1f0] sm:$0xf0] }
  0x93   : > { %v3084_v27 = vld [vmem:[%s3905_s8 + $0x2e4] sm:$0xf0]  ;;  %v2324_v29 = vld [vmem:[%s3905_s8 + $0xe8] sm:$0xf0]  ;;  %1178 = vmatmul.bf16.vlgmr.msra.gmra.mxu2 %v4027_v24  ;;  %1191 = vmatmul.bf16.vlgmr.msra.gmra.mxu3 %v4029_v25  ;;  %v3113_v13 = vld [vmem:[%s3905_s8 + $0x3d4] sm:$0xf] }
  0x94   : > { %1197 = vmatpush.bf16.msrb.mxu0 %v2419_v53  ;;  %1223 = vmatpush.bf16.msrb.mxu2 %v2423_v55  ;;  %v3080_v30 = vld [vmem:[%s3905_s8 + $0x2cc] sm:$0xf]  ;;  %v2579_v33 = vor.u32 %v3084_v27, %v2578_v23  ;;  %v2327_v34 = vor.u32 %v3016_v28, %v2324_v29  ;;  %v2290_v35 = vld [vmem:[%s3905_s8 + $0x88] sm:$0xf]  ;;  %v2716_v14 = vld [vmem:[%s3905_s8 + $0x3f0] sm:$0xf0] }
  0x95   : > { %v2580_v31 = vld [vmem:[%s3905_s8 + $0x2e8] sm:$0xf0]  ;;  %1165 = vmatmul.bf16.vlgmr.msra.gmra.mxu1 %v4029_v25  ;;  %v3012_v36 = vld [vmem:[%s3905_s8 + $0xa4] sm:$0xf0]  ;;  %1152 = vmatmul.bf16.vlgmr.msra.gmra.mxu0 %v4027_v24  ;;  %v2682_v21 = vld [vmem:[%s3905_s8 + $0x390] sm:$0xf]  ;;  %v2719_v22 = vor.u32 %v3113_v13, %v2716_v14 }
  0x96   : > { %1210 = vmatpush.bf16.msrb.mxu1 %v2675_v54  ;;  %1236 = vmatpush.bf16.msrb.mxu3 %v2679_v59  ;;  %v2546_v37 = vld [vmem:[%s3905_s8 + $0x288] sm:$0xf]  ;;  %v2583_v38 = vor.u32 %v3080_v30, %v2580_v31  ;;  %v3008_v40 = vld [vmem:[%s3905_s8 + $0x8c] sm:$0xf]  ;;  %v2291_v44 = vor.u32 %v3012_v36, %v2290_v35  ;;  %v3109_v23 = vld [vmem:[%s3905_s8 + $0x3ac] sm:$0xf0] }
  0x97   : > { %v3076_v39 = vld [vmem:[%s3905_s8 + $0x2a4] sm:$0xf0]  ;;  %v2292_v41 = vld [vmem:[%s3905_s8 + $0xa8] sm:$0xf0]  ;;  %v2428_v27 = vld [vmem:[%s3905_s8 + $0x1b0] sm:$0xf0]  ;;  %v2683_v31 = vor.u32 %v3109_v23, %v2682_v21 }
  0x98   : > { %1198 = vmatpush.bf16.msrb.mxu0 %v2387_v1  ;;  %1224 = vmatpush.bf16.msrb.mxu2 %v2391_v5  ;;  %v3072_v42 = vld [vmem:[%s3905_s8 + $0x28c] sm:$0xf]  ;;  %v2547_v45 = vor.u32 %v3076_v39, %v2546_v37  ;;  %v2295_v46 = vor.u32 %v3008_v40, %v2292_v41  ;;  %v2258_v47 = vld [vmem:[%s3905_s8 + $0x48] sm:$0xf]  ;;  %v3053_v5 = vld [vmem:[%s3905_s8 + $0x1ec] sm:$0xf0] }
  0x99   : > { %v2548_v43 = vld [vmem:[%s3905_s8 + $0x2a8] sm:$0xf0]  ;;  %v3004_v48 = vld [vmem:[%s3905_s8 + $0x64] sm:$0xf0]  ;;  %v3105_v28 = vld [vmem:[%s3905_s8 + $0x394] sm:$0xf] }
  0x9a   : > { %1211 = vmatpush.bf16.msrb.mxu1 %v2643_v4  ;;  %1237 = vmatpush.bf16.msrb.mxu3 %v2647_v11  ;;  %v2514_v49 = vld [vmem:[%s3905_s8 + $0x248] sm:$0xf]  ;;  %v2551_v50 = vor.u32 %v3072_v42, %v2548_v43  ;;  %v3000_v52 = vld [vmem:[%s3905_s8 + $0x4c] sm:$0xf]  ;;  %v2259_v56 = vor.u32 %v3004_v48, %v2258_v47  ;;  %v2458_v4 = vld [vmem:[%s3905_s8 + $0x1d0] sm:$0xf] }
  0x9b   : > { %v3068_v51 = vld [vmem:[%s3905_s8 + $0x264] sm:$0xf0]  ;;  %v2260_v53 = vld [vmem:[%s3905_s8 + $0x68] sm:$0xf0]  ;;  %v2459_v16 = vor.u32 %v3053_v5, %v2458_v4  ;;  %v2684_v29 = vld [vmem:[%s3905_s8 + $0x3b0] sm:$0xf0] }
  0x9c   : > { %1199 = vmatpush.bf16.msrb.mxu0 %v2355_v18  ;;  %1225 = vmatpush.bf16.msrb.mxu2 %v2359_v20  ;;  %v3064_v54 = vld [vmem:[%s3905_s8 + $0x24c] sm:$0xf]  ;;  %v2226_v57 = vld [vmem:[%s3905_s8 + $0x8] sm:$0xf]  ;;  %v2515_v59 = vor.u32 %v3068_v51, %v2514_v49  ;;  %v2263_v60 = vor.u32 %v3000_v52, %v2260_v53  ;;  %v2463_v18 = vor.u32 %v3049_v9, %v2460_v10  ;;  %v3045_v20 = vld [vmem:[%s3905_s8 + $0x1ac] sm:$0xf0] }
  0x9d   : > { %v2516_v55 = vld [vmem:[%s3905_s8 + $0x268] sm:$0xf0]  ;;  %v2996_v58 = vld [vmem:[%s3905_s8 + $0x24] sm:$0xf0]  ;;  %v2650_v35 = vld [vmem:[%s3905_s8 + $0x350] sm:$0xf]  ;;  %v2687_v36 = vor.u32 %v3105_v28, %v2684_v29 }
  0x9e   : > { %1212 = vmatpush.bf16.msrb.mxu1 %v2611_v19  ;;  %1238 = vmatpush.bf16.msrb.mxu3 %v2615_v26  ;;  %v2482_v61 = vld [vmem:[%s3905_s8 + $0x208] sm:$0xf]  ;;  %v2992_v63 = vld [vmem:[%s3905_s8 + $0xc] sm:$0xf]  ;;  %v2519_v0 = vor.u32 %v3064_v54, %v2516_v55  ;;  %v2227_v7 = vor.u32 %v2996_v58, %v2226_v57  ;;  %v2426_v19 = vld [vmem:[%s3905_s8 + $0x190] sm:$0xf] }
  0x9f   : > { %v3060_v62 = vld [vmem:[%s3905_s8 + $0x224] sm:$0xf0]  ;;  %v2228_v1 = vld [vmem:[%s3905_s8 + $0x28] sm:$0xf0]  ;;  %v3041_v26 = vld [vmem:[%s3905_s8 + $0x194] sm:$0xf]  ;;  %v2427_v30 = vor.u32 %v3045_v20, %v2426_v19 }
  0xa0   : > { %1200 = vmatpush.bf16.msrb.mxu0 %v2323_v32  ;;  %1226 = vmatpush.bf16.msrb.mxu2 %v2327_v34  ;;  %v3056_v2 = vld [vmem:[%s3905_s8 + $0x20c] sm:$0xf]  ;;  %v2483_v11 = vor.u32 %v3060_v62, %v2482_v61  ;;  %v2231_v12 = vor.u32 %v2992_v63, %v2228_v1  ;;  %v2431_v32 = vor.u32 %v3041_v26, %v2428_v27  ;;  %v3037_v34 = vld [vmem:[%s3905_s8 + $0x16c] sm:$0xf0]  ;;  %v2396_v39 = vld [vmem:[%s3905_s8 + $0x170] sm:$0xf0] }
  0xa1   : > { %v2484_v3 = vld [vmem:[%s3905_s8 + $0x228] sm:$0xf0]  ;;  %v3101_v37 = vld [vmem:[%s3905_s8 + $0x36c] sm:$0xf0]  ;;  %v3097_v40 = vld [vmem:[%s3905_s8 + $0x354] sm:$0xf] }
  0xa2   : > { %1213 = vmatpush.bf16.msrb.mxu1 %v2579_v33  ;;  %1239 = vmatpush.bf16.msrb.mxu3 %v2583_v38  ;;  %v2487_v15 = vor.u32 %v3056_v2, %v2484_v3  ;;  %v2394_v33 = vld [vmem:[%s3905_s8 + $0x150] sm:$0xf]  ;;  %v3033_v38 = vld [vmem:[%s3905_s8 + $0x154] sm:$0xf]  ;;  %v2651_v43 = vor.u32 %v3101_v37, %v2650_v35 }
  0xa3   : > { %v2652_v41 = vld [vmem:[%s3905_s8 + $0x370] sm:$0xf0]  ;;  %v2395_v42 = vor.u32 %v3037_v34, %v2394_v33  ;;  %v2618_v47 = vld [vmem:[%s3905_s8 + $0x310] sm:$0xf] }
  0xa4   : > { %1201 = vmatpush.bf16.msrb.mxu0 %v2291_v44  ;;  %1227 = vmatpush.bf16.msrb.mxu2 %v2295_v46  ;;  %v2399_v44 = vor.u32 %v3033_v38, %v2396_v39  ;;  %v3029_v46 = vld [vmem:[%s3905_s8 + $0x12c] sm:$0xf0]  ;;  %v2655_v48 = vor.u32 %v3097_v40, %v2652_v41  ;;  %v2364_v51 = vld [vmem:[%s3905_s8 + $0x130] sm:$0xf0]  ;;  %v2466_v40 = vld [vmem:[%s3905_s8 + $0x1d8] sm:$0xf] }
  0xa5   : > { %v3093_v49 = vld [vmem:[%s3905_s8 + $0x32c] sm:$0xf0]  ;;  %v3089_v52 = vld [vmem:[%s3905_s8 + $0x314] sm:$0xf]  ;;  %v3054_v41 = vld [vmem:[%s3905_s8 + $0x1f4] sm:$0xf0] }
  0xa6   : > { %1214 = vmatpush.bf16.msrb.mxu1 %v2547_v45  ;;  %1240 = vmatpush.bf16.msrb.mxu3 %v2551_v50  ;;  %v2362_v45 = vld [vmem:[%s3905_s8 + $0x110] sm:$0xf]  ;;  %v3025_v50 = vld [vmem:[%s3905_s8 + $0x114] sm:$0xf]  ;;  %v2619_v55 = vor.u32 %v3093_v49, %v2618_v47  ;;  %v3114_v49 = vld [vmem:[%s3905_s8 + $0x3dc] sm:$0xf] }
  0xa7   : > { %v2620_v53 = vld [vmem:[%s3905_s8 + $0x330] sm:$0xf0]  ;;  %v2363_v54 = vor.u32 %v3029_v46, %v2362_v45  ;;  %v2330_v57 = vld [vmem:[%s3905_s8 + $0xd0] sm:$0xf]  ;;  %v3050_v45 = vld [vmem:[%s3905_s8 + $0x1dc] sm:$0xf] }
  0xa8   : > { %1202 = vmatpush.bf16.msrb.mxu0 %v2259_v56  ;;  %1228 = vmatpush.bf16.msrb.mxu2 %v2263_v60  ;;  %v2367_v56 = vor.u32 %v3025_v50, %v2364_v51  ;;  %v3021_v58 = vld [vmem:[%s3905_s8 + $0xec] sm:$0xf0]  ;;  %v2623_v60 = vor.u32 %v3089_v52, %v2620_v53  ;;  %v3017_v62 = vld [vmem:[%s3905_s8 + $0xd4] sm:$0xf]  ;;  %v2468_v46 = vld [vmem:[%s3905_s8 + $0x1f8] sm:$0xf0]  ;;  %v2467_v52 = vor.u32 %v3054_v41, %v2466_v40 }
  0xa9   : > { %v3085_v61 = vld [vmem:[%s3905_s8 + $0x2ec] sm:$0xf0]  ;;  %v2332_v63 = vld [vmem:[%s3905_s8 + $0xf0] sm:$0xf0]  ;;  %v2331_v2 = vor.u32 %v3021_v58, %v2330_v57  ;;  %v2724_v50 = vld [vmem:[%s3905_s8 + $0x3f8] sm:$0xf0] }
  0xaa   : > { %1215 = vmatpush.bf16.msrb.mxu1 %v2515_v59  ;;  %1241 = vmatpush.bf16.msrb.mxu3 %v2519_v0  ;;  %v2586_v59 = vld [vmem:[%s3905_s8 + $0x2d0] sm:$0xf]  ;;  %v3081_v0 = vld [vmem:[%s3905_s8 + $0x2d4] sm:$0xf]  ;;  %v2335_v4 = vor.u32 %v3017_v62, %v2332_v63  ;;  %v2690_v57 = vld [vmem:[%s3905_s8 + $0x398] sm:$0xf]  ;;  %v2727_v58 = vor.u32 %v3114_v49, %v2724_v50 }
  0xab   : > { %v2588_v1 = vld [vmem:[%s3905_s8 + $0x2f0] sm:$0xf0]  ;;  %v2587_v3 = vor.u32 %v3085_v61, %v2586_v59  ;;  %v2298_v5 = vld [vmem:[%s3905_s8 + $0x90] sm:$0xf]  ;;  %v3110_v59 = vld [vmem:[%s3905_s8 + $0x3b4] sm:$0xf0] }
  0xac   : > { %1203 = vmatpush.bf16.msrb.mxu0 %v2227_v7  ;;  %1229 = vmatpush.bf16.msrb.mxu2 %v2231_v12  ;;  %v3013_v6 = vld [vmem:[%s3905_s8 + $0xac] sm:$0xf0]  ;;  %v2591_v8 = vor.u32 %v3081_v0, %v2588_v1  ;;  %v3009_v10 = vld [vmem:[%s3905_s8 + $0x94] sm:$0xf]  ;;  %v2436_v61 = vld [vmem:[%s3905_s8 + $0x1b8] sm:$0xf0]  ;;  %v2691_v1 = vor.u32 %v3110_v59, %v2690_v57 }
  0xad   : > { %v2554_v7 = vld [vmem:[%s3905_s8 + $0x290] sm:$0xf]  ;;  %v3073_v12 = vld [vmem:[%s3905_s8 + $0x294] sm:$0xf]  ;;  %v2299_v14 = vor.u32 %v3013_v6, %v2298_v5  ;;  %v3106_v62 = vld [vmem:[%s3905_s8 + $0x39c] sm:$0xf] }
  0xae   : > { %1216 = vmatpush.bf16.msrb.mxu1 %v2483_v11  ;;  %1242 = vmatpush.bf16.msrb.mxu3 %v2487_v15  ;;  %v3077_v9 = vld [vmem:[%s3905_s8 + $0x2ac] sm:$0xf0]  ;;  %v2300_v11 = vld [vmem:[%s3905_s8 + $0xb0] sm:$0xf0]  ;;  %v2692_v63 = vld [vmem:[%s3905_s8 + $0x3b8] sm:$0xf0] }
  0xaf   : > { %1230 = vmatmul.bf16.vlgmr.msrb.gmra.mxu2 %v4027_v24  ;;  %1204 = vmatmul.bf16.vlgmr.msrb.gmra.mxu0 %v4027_v24  ;;  %v2556_v13 = vld [vmem:[%s3905_s8 + $0x2b0] sm:$0xf0]  ;;  %v2555_v15 = vor.u32 %v3077_v9, %v2554_v7  ;;  %v2522_v19 = vld [vmem:[%s3905_s8 + $0x250] sm:$0xf]  ;;  %v2658_v5 = vld [vmem:[%s3905_s8 + $0x358] sm:$0xf]  ;;  %v2695_v6 = vor.u32 %v3106_v62, %v2692_v63 }
  0xb0   : > { %1248 = vmatpush.bf16.msra.mxu0 %v2459_v16  ;;  %1274 = vmatpush.bf16.msra.mxu2 %v2463_v18  ;;  %v2303_v16 = vor.u32 %v3009_v10, %v2300_v11  ;;  %v3005_v18 = vld [vmem:[%s3905_s8 + $0x6c] sm:$0xf0]  ;;  %v2559_v20 = vor.u32 %v3073_v12, %v2556_v13  ;;  %v2268_v23 = vld [vmem:[%s3905_s8 + $0x70] sm:$0xf0]  ;;  %v3102_v7 = vld [vmem:[%s3905_s8 + $0x374] sm:$0xf0] }
  0xb1   : > { %1243 = vmatmul.bf16.vlgmr.msrb.gmra.mxu3 %v4029_v25  ;;  %1217 = vmatmul.bf16.vlgmr.msrb.gmra.mxu1 %v4029_v25  ;;  %v3069_v21 = vld [vmem:[%s3905_s8 + $0x26c] sm:$0xf0]  ;;  %v3065_v26 = vld [vmem:[%s3905_s8 + $0x254] sm:$0xf]  ;;  %v2404_v9 = vld [vmem:[%s3905_s8 + $0x178] sm:$0xf0]  ;;  %v2659_v13 = vor.u32 %v3102_v7, %v2658_v5 }
  0xb2   : > { %1261 = vmatpush.bf16.msra.mxu1 %v2715_v17  ;;  %1287 = vmatpush.bf16.msra.mxu3 %v2719_v22  ;;  %v2266_v17 = vld [vmem:[%s3905_s8 + $0x50] sm:$0xf]  ;;  %v3001_v22 = vld [vmem:[%s3905_s8 + $0x54] sm:$0xf]  ;;  %v3098_v10 = vld [vmem:[%s3905_s8 + $0x35c] sm:$0xf] }
  0xb3   : > { %v2524_v27 = vld [vmem:[%s3905_s8 + $0x270] sm:$0xf0]  ;;  %v2267_v28 = vor.u32 %v3005_v18, %v2266_v17  ;;  %v2234_v29 = vld [vmem:[%s3905_s8 + $0x10] sm:$0xf]  ;;  %v2660_v11 = vld [vmem:[%s3905_s8 + $0x378] sm:$0xf0] }
  0xb4   : > { %1249 = vmatpush.bf16.msra.mxu0 %v2427_v30  ;;  %1275 = vmatpush.bf16.msra.mxu2 %v2431_v32  ;;  %v2997_v30 = vld [vmem:[%s3905_s8 + $0x2c] sm:$0xf0]  ;;  %v2271_v32 = vor.u32 %v3001_v22, %v2268_v23  ;;  %v2993_v35 = vld [vmem:[%s3905_s8 + $0x14] sm:$0xf]  ;;  %v2626_v17 = vld [vmem:[%s3905_s8 + $0x318] sm:$0xf]  ;;  %v2663_v18 = vor.u32 %v3098_v10, %v2660_v11 }
  0xb5   : > { %v2490_v33 = vld [vmem:[%s3905_s8 + $0x210] sm:$0xf]  ;;  %v2236_v37 = vld [vmem:[%s3905_s8 + $0x30] sm:$0xf0]  ;;  %v3090_v22 = vld [vmem:[%s3905_s8 + $0x31c] sm:$0xf] }
  0xb6   : > { %1262 = vmatpush.bf16.msra.mxu1 %v2683_v31  ;;  %1288 = vmatpush.bf16.msra.mxu3 %v2687_v36  ;;  %v2523_v31 = vor.u32 %v3069_v21, %v2522_v19  ;;  %v3061_v34 = vld [vmem:[%s3905_s8 + $0x22c] sm:$0xf0]  ;;  %v2527_v36 = vor.u32 %v3065_v26, %v2524_v27  ;;  %v3057_v38 = vld [vmem:[%s3905_s8 + $0x214] sm:$0xf]  ;;  %v3094_v19 = vld [vmem:[%s3905_s8 + $0x334] sm:$0xf0] }
  0xb7   : > { %v2492_v39 = vld [vmem:[%s3905_s8 + $0x230] sm:$0xf0]  ;;  %v2491_v47 = vor.u32 %v3061_v34, %v2490_v33  ;;  %v2372_v21 = vld [vmem:[%s3905_s8 + $0x138] sm:$0xf0]  ;;  %v2627_v27 = vor.u32 %v3094_v19, %v2626_v17  ;;  %v3086_v33 = vld [vmem:[%s3905_s8 + $0x2f4] sm:$0xf0] }
  0xb8   : > { %1250 = vmatpush.bf16.msra.mxu0 %v2395_v42  ;;  %1276 = vmatpush.bf16.msra.mxu2 %v2399_v44  ;;  %v2722_v42 = vld [vmem:[%s3905_s8 + $0x3d8] sm:$0xf]  ;;  %v2495_v51 = vor.u32 %v3057_v38, %v2492_v39  ;;  %v2628_v23 = vld [vmem:[%s3905_s8 + $0x338] sm:$0xf0] }
  0xb9   : > { %v3118_v44 = vld [vmem:[%s3905_s8 + $0x3f4] sm:$0xf0]  ;;  %v3018_v34 = vld [vmem:[%s3905_s8 + $0xdc] sm:$0xf] }
  0xba   : > { %1263 = vmatpush.bf16.msra.mxu1 %v2651_v43  ;;  %1289 = vmatpush.bf16.msra.mxu3 %v2655_v48  ;;  %v2235_v43 = vor.u32 %v2997_v30, %v2234_v29  ;;  %v2239_v48 = vor.u32 %v2993_v35, %v2236_v37  ;;  %v2723_v53 = vor.u32 %v3118_v44, %v2722_v42  ;;  %v2338_v29 = vld [vmem:[%s3905_s8 + $0xd8] sm:$0xf]  ;;  %v2340_v35 = vld [vmem:[%s3905_s8 + $0xf8] sm:$0xf0] }
  0xbb   : > { %v3022_v30 = vld [vmem:[%s3905_s8 + $0xf4] sm:$0xf0]  ;;  %v2596_v37 = vld [vmem:[%s3905_s8 + $0x2f8] sm:$0xf0]  ;;  %v2343_v40 = vor.u32 %v3018_v34, %v2340_v35  ;;  %v371_v34 = vld [vmem:[#allocation2 + $0x10] sm:$0xff] }
  0xbc   : > { %1251 = vmatpush.bf16.msra.mxu0 %v2363_v54  ;;  %1277 = vmatpush.bf16.msra.mxu2 %v2367_v56  ;;  %v2471_v54 = vor.u32 %v3050_v45, %v2468_v46  ;;  %v3046_v56 = vld [vmem:[%s3905_s8 + $0x1b4] sm:$0xf0]  ;;  %v2339_v38 = vor.u32 %v3022_v30, %v2338_v29  ;;  %v3010_v46 = vld [vmem:[%s3905_s8 + $0x9c] sm:$0xf] }
  0xbd   : > { %v2306_v41 = vld [vmem:[%s3905_s8 + $0x98] sm:$0xf]  ;;  %v2564_v49 = vld [vmem:[%s3905_s8 + $0x2b8] sm:$0xf0] }
  0xbe   : > { %1264 = vmatpush.bf16.msra.mxu1 %v2619_v55  ;;  %1290 = vmatpush.bf16.msra.mxu3 %v2623_v60  ;;  %v2434_v55 = vld [vmem:[%s3905_s8 + $0x198] sm:$0xf]  ;;  %v3042_v60 = vld [vmem:[%s3905_s8 + $0x19c] sm:$0xf] }
  0xbf   : > { %v2435_v0 = vor.u32 %v3046_v56, %v2434_v55  ;;  %v3014_v42 = vld [vmem:[%s3905_s8 + $0xb4] sm:$0xf0]  ;;  %v2276_v59 = vld [vmem:[%s3905_s8 + $0x78] sm:$0xf0] }
  0xc0   : > { %1252 = vmatpush.bf16.msra.mxu0 %v2331_v2  ;;  %1278 = vmatpush.bf16.msra.mxu2 %v2335_v4  ;;  %v2439_v2 = vor.u32 %v3042_v60, %v2436_v61  ;;  %v3038_v4 = vld [vmem:[%s3905_s8 + $0x174] sm:$0xf0]  ;;  %v2307_v50 = vor.u32 %v3014_v42, %v2306_v41  ;;  %v3066_v60 = vld [vmem:[%s3905_s8 + $0x25c] sm:$0xf] }
  0xc1   : > { %v3078_v45 = vld [vmem:[%s3905_s8 + $0x2b4] sm:$0xf0]  ;;  %v2532_v61 = vld [vmem:[%s3905_s8 + $0x278] sm:$0xf0] }
  0xc2   : > { %1265 = vmatpush.bf16.msra.mxu1 %v2587_v3  ;;  %1291 = vmatpush.bf16.msra.mxu3 %v2591_v8  ;;  %v2402_v3 = vld [vmem:[%s3905_s8 + $0x158] sm:$0xf]  ;;  %v3034_v8 = vld [vmem:[%s3905_s8 + $0x15c] sm:$0xf] }
  0xc3   : > { %v2403_v12 = vor.u32 %v3038_v4, %v2402_v3  ;;  %v2530_v55 = vld [vmem:[%s3905_s8 + $0x258] sm:$0xf]  ;;  %v2535_v4 = vor.u32 %v3066_v60, %v2532_v61  ;;  %v2244_v7 = vld [vmem:[%s3905_s8 + $0x38] sm:$0xf0] }
  0xc4   : > { %1253 = vmatpush.bf16.msra.mxu0 %v2299_v14  ;;  %1279 = vmatpush.bf16.msra.mxu2 %v2303_v16  ;;  %v2407_v14 = vor.u32 %v3034_v8, %v2404_v9  ;;  %v3030_v16 = vld [vmem:[%s3905_s8 + $0x134] sm:$0xf0]  ;;  %v3058_v8 = vld [vmem:[%s3905_s8 + $0x21c] sm:$0xf] }
  0xc5   : > { %v3070_v57 = vld [vmem:[%s3905_s8 + $0x274] sm:$0xf0]  ;;  %v2500_v9 = vld [vmem:[%s3905_s8 + $0x238] sm:$0xf0] }
  0xc6   : > { %1266 = vmatpush.bf16.msra.mxu1 %v2555_v15  ;;  %1292 = vmatpush.bf16.msra.mxu3 %v2559_v20  ;;  %v2370_v15 = vld [vmem:[%s3905_s8 + $0x118] sm:$0xf]  ;;  %v3026_v20 = vld [vmem:[%s3905_s8 + $0x11c] sm:$0xf]  ;;  %v2531_v63 = vor.u32 %v3070_v57, %v2530_v55 }
  0xc7   : > { %v2371_v26 = vor.u32 %v3030_v16, %v2370_v15  ;;  %v2498_v3 = vld [vmem:[%s3905_s8 + $0x218] sm:$0xf]  ;;  %v368_v16 = vld [vmem:[#allocation2 + $0x30] sm:$0xff] }
  0xc8   : > { %1254 = vmatpush.bf16.msra.mxu0 %v2267_v28  ;;  %1280 = vmatpush.bf16.msra.mxu2 %v2271_v32  ;;  %v2375_v28 = vor.u32 %v3026_v20, %v2372_v21  ;;  %v2631_v32 = vor.u32 %v3090_v22, %v2628_v23  ;;  %v3062_v5 = vld [vmem:[%s3905_s8 + $0x234] sm:$0xf0]  ;;  %v369_v20 = vld [vmem:[#allocation2] sm:$0xff] }
  0xc9   : > { %v2499_v11 = vor.u32 %v3062_v5, %v2498_v3  ;;  %v374_v57 = vld [vmem:[#allocation2 + $0x28] sm:$0xff] }
  0xca   : > { %1267 = vmatpush.bf16.msra.mxu1 %v2523_v31  ;;  %1293 = vmatpush.bf16.msra.mxu3 %v2527_v36  ;;  %v2594_v31 = vld [vmem:[%s3905_s8 + $0x2d8] sm:$0xf]  ;;  %v3082_v36 = vld [vmem:[%s3905_s8 + $0x2dc] sm:$0xf] }
  0xcb   : > { %v2595_v39 = vor.u32 %v3086_v33, %v2594_v31  ;;  %v2599_v44 = vor.u32 %v3082_v36, %v2596_v37 }
  0xcc   : > { %1255 = vmatpush.bf16.msra.mxu0 %v2235_v43  ;;  %1281 = vmatpush.bf16.msra.mxu2 %v2239_v48  ;;  %v2562_v43 = vld [vmem:[%s3905_s8 + $0x298] sm:$0xf]  ;;  %v3074_v48 = vld [vmem:[%s3905_s8 + $0x29c] sm:$0xf] }
  0xcd   : > { %v2567_v56 = vor.u32 %v3074_v48, %v2564_v49  ;;  %v373_v48 = vld [vmem:[#allocation2 + $0x20] sm:$0xff] }
  0xce   : > { %1268 = vmatpush.bf16.msra.mxu1 %v2491_v47  ;;  %1294 = vmatpush.bf16.msra.mxu3 %v2495_v51  ;;  %v2308_v47 = vld [vmem:[%s3905_s8 + $0xb8] sm:$0xf0]  ;;  %v2563_v51 = vor.u32 %v3078_v45, %v2562_v43 }
  0xcf   : > { %1282 = vmatmul.bf16.vlgmr.msra.gmra.mxu2 %v4027_v24  ;;  %1256 = vmatmul.bf16.vlgmr.msra.gmra.mxu0 %v4027_v24  ;;  %v372_v43 = vld [vmem:[#allocation2 + $0x8] sm:$0xff] }
  0xd0   : > { %1300 = vmatpush.bf16.msrb.mxu0 %v2467_v52  ;;  %1326 = vmatpush.bf16.msrb.mxu2 %v2471_v54  ;;  %v2311_v52 = vor.u32 %v3010_v46, %v2308_v47  ;;  %v3006_v54 = vld [vmem:[%s3905_s8 + $0x74] sm:$0xf0] }
  0xd1   : > { %1295 = vmatmul.bf16.vlgmr.msra.gmra.mxu3 %v4029_v25  ;;  %1269 = vmatmul.bf16.vlgmr.msra.gmra.mxu1 %v4029_v25 }
  0xd2   : > { %1313 = vmatpush.bf16.msrb.mxu1 %v2723_v53  ;;  %1339 = vmatpush.bf16.msrb.mxu3 %v2727_v58  ;;  %v2274_v53 = vld [vmem:[%s3905_s8 + $0x58] sm:$0xf]  ;;  %v3002_v58 = vld [vmem:[%s3905_s8 + $0x5c] sm:$0xf] }
  0xd3   : > { %v2275_v62 = vor.u32 %v3006_v54, %v2274_v53 }
  0xd4   : > { %1301 = vmatpush.bf16.msrb.mxu0 %v2435_v0  ;;  %1327 = vmatpush.bf16.msrb.mxu2 %v2439_v2  ;;  %v2279_v0 = vor.u32 %v3002_v58, %v2276_v59  ;;  %v2998_v2 = vld [vmem:[%s3905_s8 + $0x34] sm:$0xf0] }
  0xd6   : > { %1314 = vmatpush.bf16.msrb.mxu1 %v2691_v1  ;;  %1340 = vmatpush.bf16.msrb.mxu3 %v2695_v6  ;;  %v2242_v1 = vld [vmem:[%s3905_s8 + $0x18] sm:$0xf]  ;;  %v2994_v6 = vld [vmem:[%s3905_s8 + $0x1c] sm:$0xf] }
  0xd7   : > { %v2243_v10 = vor.u32 %v2998_v2, %v2242_v1 }
  0xd8   : > { %1302 = vmatpush.bf16.msrb.mxu0 %v2403_v12  ;;  %1328 = vmatpush.bf16.msrb.mxu2 %v2407_v14  ;;  %v2247_v12 = vor.u32 %v2994_v6, %v2244_v7 }
  0xda   : > { %1315 = vmatpush.bf16.msrb.mxu1 %v2659_v13  ;;  %1341 = vmatpush.bf16.msrb.mxu3 %v2663_v18  ;;  %v2503_v13 = vor.u32 %v3058_v8, %v2500_v9 }
  0xdc   : > { %1303 = vmatpush.bf16.msrb.mxu0 %v2371_v26  ;;  %1329 = vmatpush.bf16.msrb.mxu2 %v2375_v28 }
  0xde   : > { %1316 = vmatpush.bf16.msrb.mxu1 %v2627_v27  ;;  %1342 = vmatpush.bf16.msrb.mxu3 %v2631_v32 }
  0xe0   : > { %1304 = vmatpush.bf16.msrb.mxu0 %v2339_v38  ;;  %1330 = vmatpush.bf16.msrb.mxu2 %v2343_v40 }
  0xe2   : > { %1317 = vmatpush.bf16.msrb.mxu1 %v2595_v39  ;;  %1343 = vmatpush.bf16.msrb.mxu3 %v2599_v44 }
  0xe4   : > { %1305 = vmatpush.bf16.msrb.mxu0 %v2307_v50  ;;  %1331 = vmatpush.bf16.msrb.mxu2 %v2311_v52 }
  0xe6   : > { %1318 = vmatpush.bf16.msrb.mxu1 %v2563_v51  ;;  %1344 = vmatpush.bf16.msrb.mxu3 %v2567_v56 }
  0xe8   : > { %1306 = vmatpush.bf16.msrb.mxu0 %v2275_v62  ;;  %1332 = vmatpush.bf16.msrb.mxu2 %v2279_v0  ;;  %v375_v62 = vld [vmem:[#allocation2 + $0x38] sm:$0xff] }
  0xea   : > { %1319 = vmatpush.bf16.msrb.mxu1 %v2531_v63  ;;  %1345 = vmatpush.bf16.msrb.mxu3 %v2535_v4 }
  0xec   : > { %1307 = vmatpush.bf16.msrb.mxu0 %v2243_v10  ;;  %1333 = vmatpush.bf16.msrb.mxu2 %v2247_v12 }
  0xee   : > { %1320 = vmatpush.bf16.msrb.mxu1 %v2499_v11  ;;  %1346 = vmatpush.bf16.msrb.mxu3 %v2503_v13 }
  0xef   : > { %1308 = vmatmul.bf16.vlgmr.msrb.gmra.mxu0 %v4027_v24  ;;  %1334 = vmatmul.bf16.vlgmr.msrb.gmra.mxu2 %v4027_v24  ;;  %v370_v24 = vld [vmem:[#allocation2 + $0x18] sm:$0xff] }
  0xf1   : > { %1321 = vmatmul.bf16.vlgmr.msrb.gmra.mxu1 %v4029_v25  ;;  %1347 = vmatmul.bf16.vlgmr.msrb.gmra.mxu3 %v4029_v25 }
 0x112   : > { %v1166_v14 = vpop.f32.mrf.mxu1  ;;  %v1153_v15 = vpop.f32.mrf.mxu0 }
 0x113   : > { %v1167_v17 = vadd.f32 %v1166_v14, %v1153_v15 }
 0x115   : > { %v1352_v18 = vadd.f32 %v1167_v17, %v368_v16 }
 0x116   : > { %v1179_v19 = vpop.f32.mrf.mxu2  ;;  %v1192_v21 = vpop.f32.mrf.mxu3 }
 0x117   : > { %v1193_v22 = vadd.f32 %v1192_v21, %v1179_v19  ;;  %1360 = vst [vmem:[#allocation2 + $0x30] sm:$0xff] %v1352_v18 }
 0x119   : > { %v1353_v23 = vadd.f32 %v1193_v22, %v369_v20 }
 0x11a   : > { %v1168_v26 = vpop.f32.mrf.mxu1  ;;  %v1155_v27 = vpop.f32.mrf.mxu0 }
 0x11b   : > { %1361 = vst [vmem:[#allocation2] sm:$0xff] %v1353_v23 }
 0x11e   : > { %v1181_v28 = vpop.f32.mrf.mxu2  ;;  %v1194_v29 = vpop.f32.mrf.mxu3 }
 0x12c   : > { %v1205_v30 = vpop.f32.mrf.mxu0 }
 0x12e   : > { %v1218_v31 = vpop.f32.mrf.mxu1 }
 0x12f   : > { %v1219_v25 = vadd.f32 %v1218_v31, %v1205_v30 }
 0x131   : > { %v1354_v32 = vadd.f32 %v1219_v25, %v370_v24 }
 0x132   : > { %v1231_v33 = vpop.f32.mrf.mxu2 }
 0x133   : > { %1362 = vst [vmem:[#allocation2 + $0x18] sm:$0xff] %v1354_v32 }
 0x134   : > { %v1244_v35 = vpop.f32.mrf.mxu3  ;;  %v1207_v37 = vpop.f32.mrf.mxu0 }
 0x135   : > { %v1245_v36 = vadd.f32 %v1244_v35, %v1231_v33 }
 0x136   : > { %v1220_v39 = vpop.f32.mrf.mxu1 }
 0x137   : > { %v1355_v38 = vadd.f32 %v1245_v36, %v371_v34 }
 0x139   : > { %1363 = vst [vmem:[#allocation2 + $0x10] sm:$0xff] %v1355_v38 }
 0x13a   : > { %v1233_v40 = vpop.f32.mrf.mxu2 }
 0x13c   : > { %v1246_v41 = vpop.f32.mrf.mxu3 }
 0x14c   : > { %v1257_v42 = vpop.f32.mrf.mxu0 }
 0x14e   : > { %v1270_v44 = vpop.f32.mrf.mxu1 }
 0x14f   : > { %v1271_v45 = vadd.f32 %v1270_v44, %v1257_v42 }
 0x151   : > { %v1356_v46 = vadd.f32 %v1271_v45, %v372_v43 }
 0x152   : > { %v1283_v47 = vpop.f32.mrf.mxu2 }
 0x153   : > { %1364 = vst [vmem:[#allocation2 + $0x8] sm:$0xff] %v1356_v46 }
 0x154   : > { %v1296_v49 = vpop.f32.mrf.mxu3  ;;  %v1259_v51 = vpop.f32.mrf.mxu0 }
 0x155   : > { %v1297_v50 = vadd.f32 %v1296_v49, %v1283_v47 }
 0x156   : > { %v1272_v53 = vpop.f32.mrf.mxu1 }
 0x157   : > { %v1357_v52 = vadd.f32 %v1297_v50, %v373_v48 }
 0x159   : > { %1365 = vst [vmem:[#allocation2 + $0x20] sm:$0xff] %v1357_v52 }
 0x15a   : > { %v1285_v54 = vpop.f32.mrf.mxu2 }
 0x15c   : > { %v1298_v55 = vpop.f32.mrf.mxu3 }
 0x16c   : > { %v1309_v56 = vpop.f32.mrf.mxu0 }
 0x16e   : > { %v1322_v58 = vpop.f32.mrf.mxu1 }
 0x16f   : > { %v1323_v59 = vadd.f32 %v1322_v58, %v1309_v56 }
 0x171   : > { %v1358_v60 = vadd.f32 %v1323_v59, %v374_v57 }
 0x172   : > { %v1335_v61 = vpop.f32.mrf.mxu2 }
 0x173   : > { %1366 = vst [vmem:[#allocation2 + $0x28] sm:$0xff] %v1358_v60 }
 0x174   : > { %v1348_v63 = vpop.f32.mrf.mxu3  ;;  %v1311_v0 = vpop.f32.mrf.mxu0 }
 0x175   : > { %v1349_v1 = vadd.f32 %v1348_v63, %v1335_v61 }
 0x176   : > { %v1324_v2 = vpop.f32.mrf.mxu1 }
 0x177   : > { %v1359_v3 = vadd.f32 %v1349_v1, %v375_v62 }
 0x178   : > { %1371 = sbr.rel (%p2728_p0) target bundleno = 588 (0x24c), region = 68 }
 0x179   : > { %1367 = vst [vmem:[#allocation2 + $0x38] sm:$0xff] %v1359_v3 }
 0x17a   : > { %v1337_v4 = vpop.f32.mrf.mxu2 }
 0x17c   : > { %v1350_v5 = vpop.f32.mrf.mxu3 }
 0x17d   : > { %v3126_v6 = vld [vmem:[#allocation9 + $0x38] sm:$0xff]  ;;  %v3125_v10 = vld [vmem:[#allocation9 + $0x30] sm:$0xff]  ;;  %v3124_v14 = vld [vmem:[#allocation9 + $0x28] sm:$0xff] }
 0x17e   : > { %v3134_v7 = vld [vmem:[#allocation9 + $0x78] sm:$0xff]  ;;  %1938 = vmatpush.bf16.msra.mxu0 %v3126_v6  ;;  %v3133_v11 = vld [vmem:[#allocation9 + $0x70] sm:$0xff]  ;;  %v3132_v15 = vld [vmem:[#allocation9 + $0x68] sm:$0xff] }
 0x17f   : > { %v3142_v8 = vld [vmem:[#allocation9 + $0xb8] sm:$0xff]  ;;  %1951 = vmatpush.bf16.msra.mxu1 %v3134_v7  ;;  %v3141_v12 = vld [vmem:[#allocation9 + $0xb0] sm:$0xff]  ;;  %v3140_v16 = vld [vmem:[#allocation9 + $0xa8] sm:$0xff] }
 0x180   : > { %v3150_v9 = vld [vmem:[#allocation9 + $0xf8] sm:$0xff]  ;;  %1964 = vmatpush.bf16.msra.mxu2 %v3142_v8  ;;  %v3149_v13 = vld [vmem:[#allocation9 + $0xf0] sm:$0xff]  ;;  %v3148_v17 = vld [vmem:[#allocation9 + $0xe8] sm:$0xff] }
 0x181   : > { %1977 = vmatpush.bf16.msra.mxu3 %v3150_v9  ;;  %v3123_v18 = vld [vmem:[#allocation9 + $0x20] sm:$0xff]  ;;  %v3122_v22 = vld [vmem:[#allocation9 + $0x18] sm:$0xff]  ;;  %v3121_v29 = vld [vmem:[#allocation9 + $0x10] sm:$0xff] }
 0x182   : > { %1939 = vmatpush.bf16.msra.mxu0 %v3125_v10  ;;  %v3131_v19 = vld [vmem:[#allocation9 + $0x60] sm:$0xff]  ;;  %v3130_v23 = vld [vmem:[#allocation9 + $0x58] sm:$0xff]  ;;  %v3129_v30 = vld [vmem:[#allocation9 + $0x50] sm:$0xff] }
 0x183   : > { %1952 = vmatpush.bf16.msra.mxu1 %v3133_v11  ;;  %v3139_v20 = vld [vmem:[#allocation9 + $0xa0] sm:$0xff]  ;;  %v3138_v26 = vld [vmem:[#allocation9 + $0x98] sm:$0xff]  ;;  %v3137_v24 = vld [vmem:[#allocation9 + $0x90] sm:$0xff] }
 0x184   : > { %1965 = vmatpush.bf16.msra.mxu2 %v3141_v12  ;;  %v3147_v21 = vld [vmem:[#allocation9 + $0xe0] sm:$0xff]  ;;  %v3146_v27 = vld [vmem:[#allocation9 + $0xd8] sm:$0xff]  ;;  %v3145_v32 = vld [vmem:[#allocation9 + $0xd0] sm:$0xff] }
 0x185   : > { %1978 = vmatpush.bf16.msra.mxu3 %v3149_v13  ;;  %v4205_v28 = vld [vmem:[#allocation8] sm:$0xff]  ;;  %v1374_v33 = vld [vmem:[#allocation2 + $0x18] sm:$0xff]  ;;  %v1373_v38 = vld [vmem:[#allocation2] sm:$0xff] }
 0x186   : > { %1940 = vmatpush.bf16.msra.mxu0 %v3124_v14  ;;  %v1384_v31 = vperm.slane %v4205_v28, 2  ;;  %v1385_v25 = vperm.slane %v4205_v28, 3  ;;  %v1375_v34 = vld [vmem:[#allocation2 + $0x10] sm:$0xff]  ;;  %v1382_v35 = vperm.slane %v4205_v28, 0  ;;  %v1383_v36 = vperm.slane %v4205_v28, 1  ;;  %v3120_v39 = vld [vmem:[#allocation9 + $0x8] sm:$0xff] }
 0x187   : > { %1953 = vmatpush.bf16.msra.mxu1 %v3132_v15  ;;  %v1372_v37 = vld [vmem:[#allocation2 + $0x30] sm:$0xff]  ;;  %v3128_v40 = vld [vmem:[#allocation9 + $0x48] sm:$0xff]  ;;  %v3119_v47 = vld [vmem:[#allocation9] sm:$0xff] }
 0x188   : > { %1966 = vmatpush.bf16.msra.mxu2 %v3140_v16  ;;  %v1400_v41 = vadd.f32 %v1384_v31, %v1374_v33  ;;  %v1401_v42 = vadd.f32 %v1385_v25, %v1375_v34  ;;  %v3136_v43 = vld [vmem:[#allocation9 + $0x88] sm:$0xff]  ;;  %v1398_v45 = vadd.f32 %v1382_v35, %v1372_v37  ;;  %v1399_v46 = vadd.f32 %v1383_v36, %v1373_v38  ;;  %v3127_v48 = vld [vmem:[#allocation9 + $0x40] sm:$0xff]  ;;  %v3158_v55 = vld [vmem:[#allocation9 + $0x138] sm:$0xff] }
 0x189   : > { %1979 = vmatpush.bf16.msra.mxu3 %v3148_v17  ;;  %v3144_v44 = vld [vmem:[#allocation9 + $0xc8] sm:$0xff]  ;;  %v3135_v51 = vld [vmem:[#allocation9 + $0x80] sm:$0xff]  ;;  %v3166_v56 = vld [vmem:[#allocation9 + $0x178] sm:$0xff]  ;;  %v1386_v17 = vperm.slane %v4205_v28, 4 }
 0x18a   : > { %1941 = vmatpush.bf16.msra.mxu0 %v3123_v18  ;;  %v1408_v49 = vmax.f32 %v1400_v41, 0.0  ;;  %v1409_v50 = vmax.f32 %v1401_v42, 0.0  ;;  %v3143_v52 = vld [vmem:[#allocation9 + $0xc0] sm:$0xff]  ;;  %v1406_v53 = vmax.f32 %v1398_v45, 0.0  ;;  %v1407_v54 = vmax.f32 %v1399_v46, 0.0  ;;  %v3174_v57 = vld [vmem:[#allocation9 + $0x1b8] sm:$0xff] }
 0x18b   : > { %1954 = vmatpush.bf16.msra.mxu1 %v3131_v19  ;;  %v3182_v58 = vld [vmem:[#allocation9 + $0x1f8] sm:$0xff]  ;;  %v3157_v63 = vld [vmem:[#allocation9 + $0x130] sm:$0xff]  ;;  %v3156_v3 = vld [vmem:[#allocation9 + $0x128] sm:$0xff]  ;;  %v1387_v18 = vperm.slane %v4205_v28, 5 }
 0x18c   : > { %1967 = vmatpush.bf16.msra.mxu2 %v3139_v20  ;;  %v1416_v59 = vpack.c.bf16 %v1408_v49, %v1408_v49  ;;  %v1417_v60 = vpack.c.bf16 %v1409_v50, %v1409_v50  ;;  %v1414_v61 = vpack.c.bf16 %v1406_v53, %v1406_v53  ;;  %v1415_v62 = vpack.c.bf16 %v1407_v54, %v1407_v54  ;;  %v3165_v0 = vld [vmem:[#allocation9 + $0x170] sm:$0xff]  ;;  %v3164_v4 = vld [vmem:[#allocation9 + $0x168] sm:$0xff]  ;;  %v3155_v7 = vld [vmem:[#allocation9 + $0x120] sm:$0xff] }
 0x18d   : > { %1980 = vmatpush.bf16.msra.mxu3 %v3147_v21  ;;  %v3173_v1 = vld [vmem:[#allocation9 + $0x1b0] sm:$0xff]  ;;  %v3172_v5 = vld [vmem:[#allocation9 + $0x1a8] sm:$0xff]  ;;  %v3163_v8 = vld [vmem:[#allocation9 + $0x160] sm:$0xff] }
 0x18e   : > { %1942 = vmatpush.bf16.msra.mxu0 %v3122_v22  ;;  %v3181_v2 = vld [vmem:[#allocation9 + $0x1f0] sm:$0xff]  ;;  %v3180_v6 = vld [vmem:[#allocation9 + $0x1e8] sm:$0xff]  ;;  %v3171_v9 = vld [vmem:[#allocation9 + $0x1a0] sm:$0xff]  ;;  %v1388_v22 = vperm.slane %v4205_v28, 6 }
 0x18f   : > { %1955 = vmatpush.bf16.msra.mxu1 %v3130_v23  ;;  %v3179_v10 = vld [vmem:[#allocation9 + $0x1e0] sm:$0xff]  ;;  %v3154_v11 = vld [vmem:[#allocation9 + $0x118] sm:$0xff]  ;;  %v3153_v15 = vld [vmem:[#allocation9 + $0x110] sm:$0xff]  ;;  %v1389_v23 = vperm.slane %v4205_v28, 7 }
 0x190   : > { %1968 = vmatpush.bf16.msra.mxu2 %v3138_v26  ;;  %v3162_v12 = vld [vmem:[#allocation9 + $0x158] sm:$0xff]  ;;  %v3161_v16 = vld [vmem:[#allocation9 + $0x150] sm:$0xff]  ;;  %v1377_v21 = vld [vmem:[#allocation2 + $0x20] sm:$0xff] }
 0x191   : > { %1981 = vmatpush.bf16.msra.mxu3 %v3146_v27  ;;  %v3170_v13 = vld [vmem:[#allocation9 + $0x198] sm:$0xff]  ;;  %v3169_v19 = vld [vmem:[#allocation9 + $0x190] sm:$0xff]  ;;  %v3152_v31 = vld [vmem:[#allocation9 + $0x108] sm:$0xff] }
 0x192   : > { %1943 = vmatpush.bf16.msra.mxu0 %v3121_v29  ;;  %v3178_v14 = vld [vmem:[#allocation9 + $0x1d8] sm:$0xff]  ;;  %v1376_v20 = vld [vmem:[#allocation2 + $0x8] sm:$0xff]  ;;  %v1379_v29 = vld [vmem:[#allocation2 + $0x38] sm:$0xff] }
 0x193   : > { %1956 = vmatpush.bf16.msra.mxu1 %v3129_v30  ;;  %v3177_v26 = vld [vmem:[#allocation9 + $0x1d0] sm:$0xff]  ;;  %v1402_v30 = vadd.f32 %v1386_v17, %v1376_v20  ;;  %v3160_v25 = vld [vmem:[#allocation9 + $0x148] sm:$0xff]  ;;  %v1405_v33 = vadd.f32 %v1389_v23, %v1379_v29  ;;  %v3151_v28 = vld [vmem:[#allocation9 + $0x100] sm:$0xff] }
 0x194   : > { %1969 = vmatpush.bf16.msra.mxu2 %v3137_v24  ;;  %v1378_v27 = vld [vmem:[#allocation2 + $0x28] sm:$0xff]  ;;  %v1403_v24 = vadd.f32 %v1387_v18, %v1377_v21  ;;  %v3168_v34 = vld [vmem:[#allocation9 + $0x188] sm:$0xff]  ;;  %v3159_v38 = vld [vmem:[#allocation9 + $0x140] sm:$0xff] }
 0x195   : > { %1982 = vmatpush.bf16.msra.mxu3 %v3145_v32  ;;  %v1404_v32 = vadd.f32 %v1388_v22, %v1378_v27  ;;  %v3176_v35 = vld [vmem:[#allocation9 + $0x1c8] sm:$0xff]  ;;  %v1410_v36 = vmax.f32 %v1402_v30, 0.0  ;;  %v3167_v41 = vld [vmem:[#allocation9 + $0x180] sm:$0xff] }
 0x196   : > { %1944 = vmatpush.bf16.msra.mxu0 %v3120_v39  ;;  %v1411_v37 = vmax.f32 %v1403_v24, 0.0  ;;  %v3175_v42 = vld [vmem:[#allocation9 + $0x1c0] sm:$0xff] }
 0x197   : > { %1957 = vmatpush.bf16.msra.mxu1 %v3128_v40  ;;  %v1412_v39 = vmax.f32 %v1404_v32, 0.0  ;;  %v1413_v40 = vmax.f32 %v1405_v33, 0.0  ;;  %v3351_v53 = vld [vmem:[#allocation11] ss:$0 sm:$0xff] }
 0x198   : > { %1970 = vmatpush.bf16.msra.mxu2 %v3136_v43  ;;  %v1418_v43 = vpack.c.bf16 %v1410_v36, %v1410_v36 }
 0x199   : > { %1983 = vmatpush.bf16.msra.mxu3 %v3144_v44  ;;  %v1419_v44 = vpack.c.bf16 %v1411_v37, %v1411_v37  ;;  %v1420_v45 = vpack.c.bf16 %v1412_v39, %v1412_v39  ;;  %v1421_v46 = vpack.c.bf16 %v1413_v40, %v1413_v40 }
 0x19a   : > { %1945 = vmatpush.bf16.msra.mxu0 %v3119_v47 }
 0x19b   : > { %1958 = vmatpush.bf16.msra.mxu1 %v3127_v48 }
 0x19c   : > { %1971 = vmatpush.bf16.msra.mxu2 %v3135_v51 }
 0x19d   : > { %1984 = vmatpush.bf16.msra.mxu3 %v3143_v52  ;;  %1946 = vmatmul.bf16.vlgmr.msra.gmra.mxu0 %v1414_v61 }
 0x19e   : > { %1990 = vmatpush.bf16.msrb.mxu0 %v3158_v55  ;;  %1959 = vmatmul.bf16.vlgmr.msra.gmra.mxu1 %v1415_v62 }
 0x19f   : > { %2003 = vmatpush.bf16.msrb.mxu1 %v3166_v56  ;;  %1972 = vmatmul.bf16.vlgmr.msra.gmra.mxu2 %v1416_v59 }
 0x1a0   : > { %2016 = vmatpush.bf16.msrb.mxu2 %v3174_v57  ;;  %1985 = vmatmul.bf16.vlgmr.msra.gmra.mxu3 %v1417_v60 }
 0x1a1   : > { %2029 = vmatpush.bf16.msrb.mxu3 %v3182_v58 }
 0x1a2   : > { %1991 = vmatpush.bf16.msrb.mxu0 %v3157_v63 }
 0x1a3   : > { %2004 = vmatpush.bf16.msrb.mxu1 %v3165_v0 }
 0x1a4   : > { %2017 = vmatpush.bf16.msrb.mxu2 %v3173_v1 }
 0x1a5   : > { %2030 = vmatpush.bf16.msrb.mxu3 %v3181_v2 }
 0x1a6   : > { %1992 = vmatpush.bf16.msrb.mxu0 %v3156_v3 }
 0x1a7   : > { %2005 = vmatpush.bf16.msrb.mxu1 %v3164_v4 }
 0x1a8   : > { %2018 = vmatpush.bf16.msrb.mxu2 %v3172_v5 }
 0x1a9   : > { %2031 = vmatpush.bf16.msrb.mxu3 %v3180_v6 }
 0x1aa   : > { %1993 = vmatpush.bf16.msrb.mxu0 %v3155_v7 }
 0x1ab   : > { %2006 = vmatpush.bf16.msrb.mxu1 %v3163_v8 }
 0x1ac   : > { %2019 = vmatpush.bf16.msrb.mxu2 %v3171_v9 }
 0x1ad   : > { %2032 = vmatpush.bf16.msrb.mxu3 %v3179_v10 }
 0x1ae   : > { %1994 = vmatpush.bf16.msrb.mxu0 %v3154_v11 }
 0x1af   : > { %2007 = vmatpush.bf16.msrb.mxu1 %v3162_v12 }
 0x1b0   : > { %2020 = vmatpush.bf16.msrb.mxu2 %v3170_v13 }
 0x1b1   : > { %2033 = vmatpush.bf16.msrb.mxu3 %v3178_v14 }
 0x1b2   : > { %1995 = vmatpush.bf16.msrb.mxu0 %v3153_v15 }
 0x1b3   : > { %2008 = vmatpush.bf16.msrb.mxu1 %v3161_v16 }
 0x1b4   : > { %2021 = vmatpush.bf16.msrb.mxu2 %v3169_v19 }
 0x1b5   : > { %2034 = vmatpush.bf16.msrb.mxu3 %v3177_v26 }
 0x1b6   : > { %1996 = vmatpush.bf16.msrb.mxu0 %v3152_v31 }
 0x1b7   : > { %2009 = vmatpush.bf16.msrb.mxu1 %v3160_v25 }
 0x1b8   : > { %2022 = vmatpush.bf16.msrb.mxu2 %v3168_v34 }
 0x1b9   : > { %2035 = vmatpush.bf16.msrb.mxu3 %v3176_v35 }
 0x1ba   : > { %1997 = vmatpush.bf16.msrb.mxu0 %v3151_v28 }
 0x1bb   : > { %2010 = vmatpush.bf16.msrb.mxu1 %v3159_v38 }
 0x1bc   : > { %2023 = vmatpush.bf16.msrb.mxu2 %v3167_v41 }
 0x1bd   : > { %2036 = vmatpush.bf16.msrb.mxu3 %v3175_v42  ;;  %1998 = vmatmul.bf16.vlgmr.msrb.gmra.mxu0 %v1418_v43 }
 0x1be   : > { %2011 = vmatmul.bf16.vlgmr.msrb.gmra.mxu1 %v1419_v44 }
 0x1bf   : > { %2024 = vmatmul.bf16.vlgmr.msrb.gmra.mxu2 %v1420_v45 }
 0x1c0   : > { %2037 = vmatmul.bf16.vlgmr.msrb.gmra.mxu3 %v1421_v46 }
 0x21a   : > { %v1947_v47 = vpop.f32.mrf.mxu0 }
 0x21b   : > { %v1960_v48 = vpop.f32.mrf.mxu1  ;;  %v1948_v56 = vadd.f32 %v3351_v53, %v1947_v47 }
 0x21d   : > { %v1961_v57 = vadd.f32 %v1960_v48, %v1948_v56 }
 0x222   : > { %v1973_v49 = vpop.f32.mrf.mxu2  ;;  %v1949_v51 = vpop.f32.mrf.mxu0 }
 0x223   : > { %v1986_v50 = vpop.f32.mrf.mxu3  ;;  %v1962_v52 = vpop.f32.mrf.mxu1  ;;  %v1974_v58 = vadd.f32 %v1973_v49, %v1961_v57 }
 0x225   : > { %v1987_v59 = vadd.f32 %v1986_v50, %v1974_v58 }
 0x22a   : > { %v1975_v54 = vpop.f32.mrf.mxu2 }
 0x22b   : > { %v1988_v55 = vpop.f32.mrf.mxu3 }
 0x23a   : > { %v1999_v60 = vpop.f32.mrf.mxu0 }
 0x23b   : > { %v2012_v61 = vpop.f32.mrf.mxu1  ;;  %v2000_v62 = vadd.f32 %v1999_v60, %v1987_v59 }
 0x23d   : > { %v2013_v63 = vadd.f32 %v2012_v61, %v2000_v62 }
 0x242   : > { %v2025_v0 = vpop.f32.mrf.mxu2  ;;  %v2001_v3 = vpop.f32.mrf.mxu0 }
 0x243   : > { %v2038_v1 = vpop.f32.mrf.mxu3  ;;  %v2026_v2 = vadd.f32 %v2025_v0, %v2013_v63  ;;  %v2014_v4 = vpop.f32.mrf.mxu1 }
 0x245   : > { %v2039_v5 = vadd.f32 %v2038_v1, %v2026_v2 }
 0x247   : > { %2042 = vst [vmem:[%s346_s9] sm:$0xff] %v2039_v5 }
 0x24a   : > { %v2027_v6 = vpop.f32.mrf.mxu2 }
 0x24b   : > { %v2040_v7 = vpop.f32.mrf.mxu3 }
 0x24c PF: > { %s4334_s28 = sld [smem:[#allocation22_spill]]  ;;  %s2056_s5 = sshll.u32 %s346_s9, 4  ;;  %s2057_s5 = int_to_ptr.vmem [resolvable:$true] %s2056_s5 }
 0x24d   : > { %s4336_s13 = sld [smem:[#allocation34_spill]]  ;;  %s2044_s26 = scalar_lea.sflag [#allocation5], %s344_s21 }
 0x252   : > { %s2986_s10 = sshll.u32 %s4334_s28, 3 }
 0x253   : > { %s2054_s16 = scalar_lea.hbm %s4336_s13, %s2986_s10  ;;  %s3522_s20 = scalar_lea.hbm %s4336_s13, 16 }
 0x254   : > { %s2058_s14 = sshll.u32 %s2054_s16, 4  ;;  %s2059_s14 = int_to_ptr.hbm [resolvable:$true] %s2058_s14 }
 0x255   : > { %s3516_s27 = sshra.s32 %s2059_s14, 4  ;;  %s3517_s27 = int_to_ptr.hbm [resolvable:$true] %s3516_s27 }
 0x256   : > { %s3518_s18 = scalar_lea.hbm %s3517_s27, 8  ;;  %p3523_p13 = scmp.lt.s32.totalorder %s3517_s27, %s4336_s13 }
 0x257   : > { %p3519_p11 = scmp.ne.s32.totalorder %s3517_s27, %s3518_s18  ;;  %p3524_p1 = scmp.lt.s32.totalorder %s3522_s20, %s3518_s18 }
 0x259   : > { %p3520_p5 = pnand %p3519_p11, %p3785_p6  ;;  %p3525_p2 = por %p3524_p1, %p3523_p13 }
 0x25b   : > { %p3521_p12 = pneg %p3520_p5 }
 0x25d   : > { %p3526_p7 = pnand %p3525_p2, %p3521_p12 }
 0x25f   : > { %3529 = shalt.err (!%p3526_p7)
}
 0x260   : > { %3200 = dma.vmem_to_hbm [thread:$0]  (%p3785_p6), %s2057_s5, 128, %s2059_s14, %s2044_s26  }
 0x261 PF: > { %s4337_s8 = sld [smem:[#allocation18_spill]]  ;;  %p3230_p8 = scmp.ge.s32.totalorder %s3660_s6, 2 }
 0x263   : > { %p3220_p3 = pnand %p3230_p8, %p3791_p10 }
 0x265   : > { %p3221_p9 = pneg %p3220_p3 }
 0x267   : > { %s2070_s17 = sand.u32 1, %s4337_s8  }
 0x268   : > { %s2071_s9 = scalar_lea.sflag [#allocation5], %s2070_s17 }
 0x269   : > { %3603 = dma.done.wait (%p3221_p9), %s2071_s9, 128  }
 0x26a   : > { %3605 = vsyncadd (%p3221_p9), %s2071_s9, 4294967168  ;;  %s25_s6 = sadd.s32 1, %s3660_s6   ;;  %s4340_s7 = sld [smem:[#allocation19_spill]] }
 0x26b   : > { %p4240_p4 = scmp.ge.s32.totalorder %s25_s6, 8   ;;  %s4341_s20 = sld [smem:[#allocation30_spill]] }
 0x26c   : > { %s4342_s28 = sld [smem:[#allocation28_spill]]  ;;  %s4348_s18 = smov %s3612_s19 }
 0x26d   : > { %s4343_s3 = sld [smem:[#allocation20_spill]]  ;;  %s4350_s21 = smov %s3624_s22 }
 0x26e   : > { %s4344_s26 = sld [smem:[#allocation29_spill]]  ;;  %s4351_s22 = smov %s3628_s23 }
 0x26f   : > { %s4345_s10 = sld [smem:[#allocation23_spill]]  ;;  %s4353_s24 = smov %s3636_s25 }
 0x270   : > { %s4346_s2 = sld [smem:[#allocation26_spill]]  ;;  %s4349_s19 = smov %s4340_s7 }
 0x271   : > { %s4347_s30 = sld [smem:[#allocation27_spill]]  ;;  %s4355_s27 = smov %s3652_s29 }
 0x272   : > { %s4352_s23 = smov %s4342_s28  ;;  %24 = sbr.rel (!%p4240_p4) target bundleno = 18 (0x12), region = 118 }
 0x273   : > { %s4354_s25 = smov %s4343_s3 }
 0x275   : > { %s4356_s28 = smov %s4345_s10 }
 0x276   : > { %s4357_s29 = smov %s4346_s2 }
 0x277   :  { %2077 = vsyncpa [#allocation4], 1 }
 0x278   :  { %2079 = vsyncpa [#allocation4 + $0x1], 1 }
 0x279   :  { %2080 = vsyncpa [#allocation7], 1 }
 0x27a   :  { %2082 = vsyncpa [#allocation7 + $0x1], 1 }
 0x27b   :  { %2083 = vsyncpa [#allocation10], 1 }
 0x27c   :  { %2084 = vsyncpa [#allocation5], 1 }
 0x27d   :  { %2086 = vsyncpa [#allocation5 + $0x1], 1 }

</bundles_post_ra>
